<compile_context>
chip_gen: v7x
topology: tpu7x:2x2x1
jax: 0.10.0
libtpu: 0.0.40
codegen_flags: <defaults>
</compile_context>

<pallas_src>
import math
import functools
import numpy as np
import jax
import jax.numpy as jnp
from jax.experimental import pallas as pl
from jax.experimental.pallas import tpu as pltpu

# ----------------------- small, shape-consistent config -----------------------
B = 2            # batch
S = 8            # seqlen
DIM = 128        # model dim
N_HEAD = 4       # query heads
N_KV = 2         # kv ("local") heads
HEAD_DIM = 128   # head dim (lane friendly)
R = N_HEAD // N_KV
EPS = 1e-6
ROPE_BASE = 1_000_000.0
SCALE = 1.0 / math.sqrt(HEAD_DIM)    # F.scaled_dot_product_attention default scale
NEG_INF = -1e30


def _tensorcores_per_chip() -> int:
    # v7x exposes 2 TensorCores per chip; v5e/v6e have 1.
    try:
        kind = jax.devices()[0].device_kind.lower()
    except Exception:
        return 1
    return 2 if ("v7" in kind or "7x" in kind) else 1


# ------------------------------- Pallas kernel --------------------------------
def attention_kernel(x_q_ref, x_kv_ref, wq_ref, wkv_ref, wo_ref,
                     cq_ref, sq_ref, ck_ref, sk_ref,
                     out_ref,
                     q_scr, m_scr, l_scr, acc_scr,
                     *, seq_len, tq, tkv):
    qi = pl.program_id(1)
    ki = pl.program_id(2)
    n_kv_steps = pl.num_programs(2)
    half = HEAD_DIM // 2

    def rmsnorm(h):
        return h * jax.lax.rsqrt(jnp.mean(h * h, axis=-1, keepdims=True) + EPS)

    def rope(h, cos, sin):
        # split-half RoPE; RMS gain (and softmax scale for q) folded into cos/sin
        return h * cos + pltpu.roll(h, half, axis=1) * sin

    # --- kv step 0: project/norm/rope the q tile once; reset online-softmax state ---
    @pl.when(ki == 0)
    def _init():
        xq = x_q_ref[...]                                              # (tq, DIM) bf16
        q_all = jnp.dot(xq, wq_ref[...],
                        preferred_element_type=jnp.float32)            # (tq, H*D) f32
        cq = cq_ref[...]
        sq = sq_ref[...]
        for h in range(N_HEAD):                                        # 128-lane col slices
            qh = rope(rmsnorm(q_all[:, h * HEAD_DIM:(h + 1) * HEAD_DIM]), cq, sq)
            q_scr[h * tq:(h + 1) * tq, :] = qh.astype(jnp.bfloat16)    # head-major rows
        m_scr[...] = jnp.full_like(m_scr, NEG_INF)
        l_scr[...] = jnp.zeros_like(l_scr)
        acc_scr[...] = jnp.zeros_like(acc_scr)

    # --- every kv step: project/norm/rope this kv tile (tail rows are zero-padded) ---
    xkv = x_kv_ref[...]                                                # (tkv, DIM) bf16
    kv = jnp.dot(xkv, wkv_ref[...], preferred_element_type=jnp.float32)  # (tkv, 2*Hkv*D)
    ck = ck_ref[...]
    sk = sk_ref[...]

    # causal + padding mask generated in-kernel (VPU iota, no mask DMA).
    # q_scr rows are head-major within a kv group -> q position = row % tq.
    rows = R * tq
    r_iota = jax.lax.broadcasted_iota(jnp.int32, (rows, tkv), 0)
    c_iota = jax.lax.broadcasted_iota(jnp.int32, (rows, tkv), 1)
    q_pos = qi * tq + (r_iota % tq)
    k_pos = ki * tkv + c_iota
    mask_add = jnp.where((k_pos <= q_pos) & (k_pos < seq_len),
                         0.0, NEG_INF).astype(jnp.float32)

    for g in range(N_KV):                                              # grouped GQA
        kg = rope(rmsnorm(kv[:, g * HEAD_DIM:(g + 1) * HEAD_DIM]), ck, sk)
        kg = kg.astype(jnp.bfloat16)                                   # (tkv, D)
        vg = kv[:, (N_KV + g) * HEAD_DIM:(N_KV + g + 1) * HEAD_DIM].astype(jnp.bfloat16)

        r0, r1 = g * rows, (g + 1) * rows
        qg = q_scr[r0:r1, :]                                           # (rows, D) bf16
        s = jnp.einsum('qd,kd->qk', qg, kg,
                       preferred_element_type=jnp.float32)             # (rows, tkv) f32
        s = s + mask_add

        m_prev = m_scr[r0:r1, :]
        m_new = jnp.maximum(m_prev, jnp.max(s, axis=-1, keepdims=True))
        alpha = jnp.exp(m_prev - m_new)
        p = jnp.exp(s - m_new)
        l_scr[r0:r1, :] = alpha * l_scr[r0:r1, :] + jnp.sum(p, axis=-1, keepdims=True)
        acc_scr[r0:r1, :] = alpha * acc_scr[r0:r1, :] + jnp.dot(
            p.astype(jnp.bfloat16), vg, preferred_element_type=jnp.float32)
        m_scr[r0:r1, :] = m_new

    # --- last kv step: normalize, repack heads along lanes, o_proj, write out ---
    @pl.when(ki == n_kv_steps - 1)
    def _finalize():
        y = acc_scr[...] * pl.reciprocal(l_scr[...], approx=True)      # (H*tq, D) f32
        y_cat = jnp.concatenate(
            [y[h * tq:(h + 1) * tq, :] for h in range(N_HEAD)], axis=1
        ).astype(jnp.bfloat16)                                         # (tq, H*D)
        out = jnp.dot(y_cat, wo_ref[...], preferred_element_type=jnp.float32)
        out_ref[...] = out.astype(out_ref.dtype)


def attention_pallas(x_q, x_kv, wq, wkv, wo, cq, sq, ck, sk, *, seq_len, tq, tkv):
    bsz = x_q.shape[0]
    n_q = x_q.shape[1] // tq
    n_kv = x_kv.shape[1] // tkv
    grid = (bsz, n_q, n_kv)

    # Don't shard a tiny problem across v7x's 2 TensorCores: redundant weight DMA
    # + per-step pipeline setup (~0.35us) would dwarf ~1us of compute.
    total_q_rows = bsz * seq_len * N_HEAD
    if _tensorcores_per_chip() > 1 and total_q_rows < 1024:
        dim_sem = ("arbitrary", "arbitrary", "arbitrary")
    else:
        dim_sem = ("parallel", "parallel", "arbitrary")

    # advisory scheduling hint for XLA around the custom call
    qd, kvd = N_HEAD * HEAD_DIM, 2 * N_KV * HEAD_DIM
    steps = bsz * n_q * n_kv
    flops = (bsz * n_q) * (2 * tq * DIM * qd + 2 * tq * qd * DIM) \
        + steps * (2 * tkv * DIM * kvd + 2 * 2 * N_KV * R * tq * tkv * HEAD_DIM)
    transcendentals = steps * N_KV * R * tq * tkv
    bytes_accessed = sum(int(np.prod(a.shape)) * a.dtype.itemsize
                         for a in (x_q, x_kv, wq, wkv, wo, cq, sq, ck, sk))
    bytes_accessed += bsz * seq_len * DIM * 4   # f32 output

    kernel = functools.partial(attention_kernel, seq_len=seq_len, tq=tq, tkv=tkv)
    return pl.pallas_call(
        kernel,
        out_shape=jax.ShapeDtypeStruct((bsz, seq_len, DIM), jnp.float32),
        grid=grid,
        in_specs=[
            pl.BlockSpec((None, tq, DIM), lambda b, qi, ki: (b, qi, 0)),    # x (q rows)
            pl.BlockSpec((None, tkv, DIM), lambda b, qi, ki: (b, ki, 0)),   # x (kv rows, padded)
            pl.BlockSpec(wq.shape, lambda b, qi, ki: (0, 0)),               # wq   (resident)
            pl.BlockSpec(wkv.shape, lambda b, qi, ki: (0, 0)),              # wk|wv (resident)
            pl.BlockSpec(wo.shape, lambda b, qi, ki: (0, 0)),               # wo   (resident)
            pl.BlockSpec((tq, HEAD_DIM), lambda b, qi, ki: (qi, 0)),        # cos_q (per pos)
            pl.BlockSpec((tq, HEAD_DIM), lambda b, qi, ki: (qi, 0)),        # sin_q
            pl.BlockSpec((tkv, HEAD_DIM), lambda b, qi, ki: (ki, 0)),       # cos_k
            pl.BlockSpec((tkv, HEAD_DIM), lambda b, qi, ki: (ki, 0)),       # sin_k
        ],
        out_specs=pl.BlockSpec((None, tq, DIM), lambda b, qi, ki: (b, qi, 0)),
        scratch_shapes=[
            pltpu.VMEM((N_HEAD * tq, HEAD_DIM), jnp.bfloat16),   # rope'd+scaled q tile
            pltpu.VMEM((N_HEAD * tq, 1), jnp.float32),           # running max
            pltpu.VMEM((N_HEAD * tq, 1), jnp.float32),           # running denom
            pltpu.VMEM((N_HEAD * tq, HEAD_DIM), jnp.float32),    # output accumulator
        ],
        compiler_params=pltpu.CompilerParams(
            dimension_semantics=dim_sem,
            # tiles are sized to fit v7x's 64 MiB VMEM too; 32 MiB scoped is plenty here
            vmem_limit_bytes=32 * 1024 * 1024,
        ),
        cost_estimate=pl.CostEstimate(flops=int(flops),
                                      transcendentals=int(transcendentals),
                                      bytes_accessed=int(bytes_accessed)),
    )(x_q, x_kv, wq, wkv, wo, cq, sq, ck, sk)


# -------------------------- host-side weight/table prep -------------------------
def prepare_inputs(x, wq, wk, wv, wo, qn_w, kn_w, cos, sin, tkv):
    half = HEAD_DIM // 2
    # interleaved-pair -> split-half permutation (new index -> old index)
    perm = np.concatenate([np.arange(0, HEAD_DIM, 2), np.arange(1, HEAD_DIM, 2)])

    # permute per-head columns of wq/wk into split-half order (q.k is invariant to a
    # consistent per-head permutation); v and wo are NOT permuted.  bf16 weights.
    wq_p = wq.reshape(DIM, N_HEAD, HEAD_DIM)[:, :, perm].reshape(DIM, N_HEAD * HEAD_DIM)
    wk_p = wk.reshape(DIM, N_KV, HEAD_DIM)[:, :, perm].reshape(DIM, N_KV * HEAD_DIM)
    wq_bf = wq_p.astype(jnp.bfloat16)                                     # (128, 512)
    wkv_bf = jnp.concatenate([wk_p, wv], axis=1).astype(jnp.bfloat16)     # (128, 512)
    wo_bf = wo.astype(jnp.bfloat16)                                       # (512, 128)

    # split-half cos / sign-folded sin tables; fold RMS gains (+ softmax scale on q).
    # One row per position -- NOT expanded per head (kernel reuses them per head).
    cos_sh = jnp.concatenate([cos, cos], axis=-1)                          # (S, D)
    sin_sh = jnp.concatenate([-sin, sin], axis=-1)                         # (S, D)
    qg = qn_w[perm]
    kg = kn_w[perm]
    cq = (cos_sh * qg[None, :] * SCALE).astype(jnp.float32)
    sq = (sin_sh * jnp.roll(qg, half)[None, :] * SCALE).astype(jnp.float32)
    ck = (cos_sh * kg[None, :]).astype(jnp.float32)
    sk = (sin_sh * jnp.roll(kg, half)[None, :]).astype(jnp.float32)

    # x passed in bf16 (it is a bf16 matmul operand anyway); the kv-side copy is
    # zero-padded to a lane-dense multiple of the kv tile (padding masked in-kernel).
    s_pad = -(-S // tkv) * tkv
    x_q = x.astype(jnp.bfloat16)
    x_kv = jnp.zeros((B, s_pad, DIM), jnp.bfloat16).at[:, :S, :].set(x_q)
    ck_p = jnp.zeros((s_pad, HEAD_DIM), jnp.float32).at[:S, :].set(ck)
    sk_p = jnp.zeros((s_pad, HEAD_DIM), jnp.float32).at[:S, :].set(sk)

    return x_q, x_kv, wq_bf, wkv_bf, wo_bf, cq, sq, ck_p, sk_p


# ------------------------------ pure-JAX reference -----------------------------
def apply_rotary_ref(x, cos, sin):
    xr = x.astype(jnp.float32).reshape(*x.shape[:-1], -1, 2)
    x0, x1 = xr[..., 0], xr[..., 1]
    c = cos[None, :, None, :]
    s = sin[None, :, None, :]
    o0 = x0 * c - x1 * s
    o1 = x1 * c + x0 * s
    return jnp.stack([o0, o1], axis=-1).reshape(x.shape).astype(x.dtype)


def rms_ref(x, w):
    xf = x.astype(jnp.float32)
    return (xf * jax.lax.rsqrt(jnp.mean(xf * xf, axis=-1, keepdims=True) + EPS) * w).astype(x.dtype)


def attention_ref(x, wq, wk, wv, wo, qn_w, kn_w, cos, sin, mask):
    q = (x @ wq).reshape(B, S, N_HEAD, HEAD_DIM)
    k = (x @ wk).reshape(B, S, N_KV, HEAD_DIM)
    v = (x @ wv).reshape(B, S, N_KV, HEAD_DIM)
    q = rms_ref(q, qn_w)
    k = rms_ref(k, kn_w)
    q = apply_rotary_ref(q, cos, sin)
    k = apply_rotary_ref(k, cos, sin)
    q, k, v = (t.transpose(0, 2, 1, 3) for t in (q, k, v))          # (B, H, S, D)
    k = jnp.repeat(k, R, axis=1)
    v = jnp.repeat(v, R, axis=1)
    scores = jnp.einsum('bhqd,bhkd->bhqk', q, k) * SCALE + mask[None, None]
    p = jax.nn.softmax(scores, axis=-1)
    y = jnp.einsum('bhqk,bhkd->bhqd', p, v)
    y = y.transpose(0, 2, 1, 3).reshape(B, S, N_HEAD * HEAD_DIM)
    return y @ wo


# ----------------------------------- main --------------------------------------
if __name__ == "__main__":
    key = jax.random.PRNGKey(0)
    kx, kq, kk, kv, ko, kqn, kkn = jax.random.split(key, 7)

    x = jax.random.normal(kx, (B, S, DIM), dtype=jnp.float32)

    # PyTorch Linear stores (out, in); pre-transpose to (in, out) so the kernel does x @ W.
    wq = (jax.random.normal(kq, (N_HEAD * HEAD_DIM, DIM), jnp.float32) * 0.02).T
    wk = (jax.random.normal(kk, (N_KV * HEAD_DIM, DIM), jnp.float32) * 0.02).T
    wv = (jax.random.normal(kv, (N_KV * HEAD_DIM, DIM), jnp.float32) * 0.02).T
    wo = (jax.random.normal(ko, (DIM, N_HEAD * HEAD_DIM), jnp.float32) * 0.02).T

    # non-trivial RMSNorm gains to exercise the host-side fold
    qn_w = 1.0 + 0.1 * jax.random.normal(kqn, (HEAD_DIM,), jnp.float32)
    kn_w = 1.0 + 0.1 * jax.random.normal(kkn, (HEAD_DIM,), jnp.float32)

    # freqs_cis (cos/sin halves), per position
    inv_freq = 1.0 / (ROPE_BASE ** (jnp.arange(0, HEAD_DIM, 2, dtype=jnp.float32) / HEAD_DIM))
    ang = jnp.arange(S, dtype=jnp.float32)[:, None] * inv_freq[None, :]     # (S, D/2)
    cos, sin = jnp.cos(ang), jnp.sin(ang)

    # additive causal mask for the reference (kernel generates it in-kernel)
    causal = jnp.tril(jnp.ones((S, S), bool))
    mask = jnp.where(causal, 0.0, NEG_INF).astype(jnp.float32)

    # tile sizes: lane-dense kv tiles (multiple of 128, tail padded + masked);
    # q tile = full S at this toy size.
    tq = S
    tkv = 128
    assert S % tq == 0 and tq % 8 == 0

    args = prepare_inputs(x, wq, wk, wv, wo, qn_w, kn_w, cos, sin, tkv)
    out = attention_pallas(*args, seq_len=S, tq=tq, tkv=tkv)
    out = jax.block_until_ready(out)

    ref = attention_ref(x, wq, wk, wv, wo, qn_w, kn_w, cos, sin, mask)
    np.testing.assert_allclose(np.asarray(out), np.asarray(ref), rtol=3e-2, atol=3e-2)

    print("KERNEL_OK")
</pallas_src>

<mosaic_0001>
module attributes {stable_mosaic.version = 11 : i64} {
  func.func @attention_kernel(%arg0: i32, %arg1: i32, %arg2: i32, %arg3: memref<1x8x128xbf16, #tpu.memory_space<vmem>>, %arg4: memref<1x128x128xbf16, #tpu.memory_space<vmem>>, %arg5: memref<128x512xbf16, #tpu.memory_space<vmem>>, %arg6: memref<128x512xbf16, #tpu.memory_space<vmem>>, %arg7: memref<512x128xbf16, #tpu.memory_space<vmem>>, %arg8: memref<8x128xf32, #tpu.memory_space<vmem>>, %arg9: memref<8x128xf32, #tpu.memory_space<vmem>>, %arg10: memref<128x128xf32, #tpu.memory_space<vmem>>, %arg11: memref<128x128xf32, #tpu.memory_space<vmem>>, %arg12: memref<1x8x128xf32, #tpu.memory_space<vmem>>, %arg13: memref<32x128xbf16, #tpu.memory_space<vmem>>, %arg14: memref<32x1xf32, #tpu.memory_space<vmem>>, %arg15: memref<32x1xf32, #tpu.memory_space<vmem>>, %arg16: memref<32x128xf32, #tpu.memory_space<vmem>>) attributes {dimension_semantics = [#tpu.dimension_semantics<parallel>, #tpu.dimension_semantics<parallel>, #tpu.dimension_semantics<arbitrary>], iteration_bounds = array<i64: 2, 1, 1>, scalar_prefetch = 0 : i64, scratch_operands = 4 : i64, tpu.core_type = #tpu.core_type<tc>, window_params = [{transform_indices = @transform_0, window_bounds = array<i64: 1, 8, 128>}, {transform_indices = @transform_1, window_bounds = array<i64: 1, 128, 128>}, {pipeline_mode = #tpu.pipeline_mode<synchronous>, transform_indices = @transform_2, window_bounds = array<i64: 128, 512>}, {pipeline_mode = #tpu.pipeline_mode<synchronous>, transform_indices = @transform_3, window_bounds = array<i64: 128, 512>}, {pipeline_mode = #tpu.pipeline_mode<synchronous>, transform_indices = @transform_4, window_bounds = array<i64: 512, 128>}, {transform_indices = @transform_5, window_bounds = array<i64: 8, 128>}, {transform_indices = @transform_6, window_bounds = array<i64: 8, 128>}, {transform_indices = @transform_7, window_bounds = array<i64: 128, 128>}, {transform_indices = @transform_8, window_bounds = array<i64: 128, 128>}, {transform_indices = @transform_9, window_bounds = array<i64: 1, 8, 128>}]} {
    %c0_i32 = arith.constant 0 : i32
    %0 = arith.cmpi eq, %arg2, %c0_i32 : i32
    %1 = arith.extui %0 : i1 to i32
    %c0_i32_0 = arith.constant 0 : i32
    %2 = arith.cmpi ne, %1, %c0_i32_0 : i32
    scf.if %2 {
      %c0_61 = arith.constant 0 : index
      %c0_62 = arith.constant 0 : index
      %c0_63 = arith.constant 0 : index
      %131 = vector.load %arg3[%c0_61, %c0_62, %c0_63] : memref<1x8x128xbf16, #tpu.memory_space<vmem>>, vector<1x8x128xbf16>
      %132 = vector.shape_cast %131 : vector<1x8x128xbf16> to vector<8x128xbf16>
      %c0_64 = arith.constant 0 : index
      %c0_65 = arith.constant 0 : index
      %133 = vector.load %arg5[%c0_64, %c0_65] : memref<128x512xbf16, #tpu.memory_space<vmem>>, vector<128x512xbf16>
      %cst_66 = arith.constant dense<0.000000e+00> : vector<8x512xf32>
      %134 = tpu.matmul %132, %133, %cst_66 {dimension_numbers = #tpu.dot_dimension_numbers<[1], [0], [0], [1], [0, 0, 1, 1], [], []>} : vector<8x128xbf16>, vector<128x512xbf16>, vector<8x512xf32> -> vector<8x512xf32>
      %c0_67 = arith.constant 0 : index
      %c0_68 = arith.constant 0 : index
      %135 = vector.load %arg8[%c0_67, %c0_68] : memref<8x128xf32, #tpu.memory_space<vmem>>, vector<8x128xf32>
      %c0_69 = arith.constant 0 : index
      %c0_70 = arith.constant 0 : index
      %136 = vector.load %arg9[%c0_69, %c0_70] : memref<8x128xf32, #tpu.memory_space<vmem>>, vector<8x128xf32>
      %137 = vector.extract_strided_slice %134 {offsets = [0, 0], sizes = [8, 128], strides = [1, 1]} : vector<8x512xf32> to vector<8x128xf32>
      %138 = arith.mulf %137, %137 : vector<8x128xf32>
      %cst_71 = arith.constant dense<0.000000e+00> : vector<8xf32>
      %139 = vector.multi_reduction <add>, %138, %cst_71 [1] : vector<8x128xf32> to vector<8xf32>
      %140 = vector.shape_cast %139 : vector<8xf32> to vector<8x1xf32>
      %cst_72 = arith.constant 1.280000e+02 : f32
      %141 = vector.broadcast %cst_72 : f32 to vector<8x1xf32>
      %142 = arith.divf %140, %141 : vector<8x1xf32>
      %cst_73 = arith.constant 9.99999997E-7 : f32
      %143 = vector.broadcast %cst_73 : f32 to vector<8x1xf32>
      %144 = arith.addf %142, %143 : vector<8x1xf32>
      %145 = math.rsqrt %144 : vector<8x1xf32>
      %146 = vector.broadcast %145 : vector<8x1xf32> to vector<8x128xf32>
      %147 = arith.mulf %137, %146 : vector<8x128xf32>
      %148 = arith.mulf %147, %135 : vector<8x128xf32>
      %c64_i32_74 = arith.constant 64 : i32
      %149 = tpu.dynamic_rotate %147 by %c64_i32_74 dim 1 : vector<8x128xf32>, i32 -> vector<8x128xf32>
      %150 = arith.mulf %149, %136 : vector<8x128xf32>
      %151 = arith.addf %148, %150 : vector<8x128xf32>
      %152 = arith.truncf %151 : vector<8x128xf32> to vector<8x128xbf16>
      %c0_75 = arith.constant 0 : index
      %c0_76 = arith.constant 0 : index
      %153 = vector.load %arg13[%c0_75, %c0_76] : memref<32x128xbf16, #tpu.memory_space<vmem>>, vector<8x128xbf16>
      tpu.vector_store %arg13[%c0_75, %c0_76], %152 {strides = array<i32>} : memref<32x128xbf16, #tpu.memory_space<vmem>>, vector<8x128xbf16>,
      %154 = vector.extract_strided_slice %134 {offsets = [0, 128], sizes = [8, 128], strides = [1, 1]} : vector<8x512xf32> to vector<8x128xf32>
      %155 = arith.mulf %154, %154 : vector<8x128xf32>
      %cst_77 = arith.constant dense<0.000000e+00> : vector<8xf32>
      %156 = vector.multi_reduction <add>, %155, %cst_77 [1] : vector<8x128xf32> to vector<8xf32>
      %157 = vector.shape_cast %156 : vector<8xf32> to vector<8x1xf32>
      %cst_78 = arith.constant 1.280000e+02 : f32
      %158 = vector.broadcast %cst_78 : f32 to vector<8x1xf32>
      %159 = arith.divf %157, %158 : vector<8x1xf32>
      %cst_79 = arith.constant 9.99999997E-7 : f32
      %160 = vector.broadcast %cst_79 : f32 to vector<8x1xf32>
      %161 = arith.addf %159, %160 : vector<8x1xf32>
      %162 = math.rsqrt %161 : vector<8x1xf32>
      %163 = vector.broadcast %162 : vector<8x1xf32> to vector<8x128xf32>
      %164 = arith.mulf %154, %163 : vector<8x128xf32>
      %165 = arith.mulf %164, %135 : vector<8x128xf32>
      %c64_i32_80 = arith.constant 64 : i32
      %166 = tpu.dynamic_rotate %164 by %c64_i32_80 dim 1 : vector<8x128xf32>, i32 -> vector<8x128xf32>
      %167 = arith.mulf %166, %136 : vector<8x128xf32>
      %168 = arith.addf %165, %167 : vector<8x128xf32>
      %169 = arith.truncf %168 : vector<8x128xf32> to vector<8x128xbf16>
      %c8 = arith.constant 8 : index
      %c0_81 = arith.constant 0 : index
      %170 = vector.load %arg13[%c8, %c0_81] : memref<32x128xbf16, #tpu.memory_space<vmem>>, vector<8x128xbf16>
      tpu.vector_store %arg13[%c8, %c0_81], %169 {strides = array<i32>} : memref<32x128xbf16, #tpu.memory_space<vmem>>, vector<8x128xbf16>,
      %171 = vector.extract_strided_slice %134 {offsets = [0, 256], sizes = [8, 128], strides = [1, 1]} : vector<8x512xf32> to vector<8x128xf32>
      %172 = arith.mulf %171, %171 : vector<8x128xf32>
      %cst_82 = arith.constant dense<0.000000e+00> : vector<8xf32>
      %173 = vector.multi_reduction <add>, %172, %cst_82 [1] : vector<8x128xf32> to vector<8xf32>
      %174 = vector.shape_cast %173 : vector<8xf32> to vector<8x1xf32>
      %cst_83 = arith.constant 1.280000e+02 : f32
      %175 = vector.broadcast %cst_83 : f32 to vector<8x1xf32>
      %176 = arith.divf %174, %175 : vector<8x1xf32>
      %cst_84 = arith.constant 9.99999997E-7 : f32
      %177 = vector.broadcast %cst_84 : f32 to vector<8x1xf32>
      %178 = arith.addf %176, %177 : vector<8x1xf32>
      %179 = math.rsqrt %178 : vector<8x1xf32>
      %180 = vector.broadcast %179 : vector<8x1xf32> to vector<8x128xf32>
      %181 = arith.mulf %171, %180 : vector<8x128xf32>
      %182 = arith.mulf %181, %135 : vector<8x128xf32>
      %c64_i32_85 = arith.constant 64 : i32
      %183 = tpu.dynamic_rotate %181 by %c64_i32_85 dim 1 : vector<8x128xf32>, i32 -> vector<8x128xf32>
      %184 = arith.mulf %183, %136 : vector<8x128xf32>
      %185 = arith.addf %182, %184 : vector<8x128xf32>
      %186 = arith.truncf %185 : vector<8x128xf32> to vector<8x128xbf16>
      %c16_86 = arith.constant 16 : index
      %c0_87 = arith.constant 0 : index
      %187 = vector.load %arg13[%c16_86, %c0_87] : memref<32x128xbf16, #tpu.memory_space<vmem>>, vector<8x128xbf16>
      tpu.vector_store %arg13[%c16_86, %c0_87], %186 {strides = array<i32>} : memref<32x128xbf16, #tpu.memory_space<vmem>>, vector<8x128xbf16>,
      %188 = vector.extract_strided_slice %134 {offsets = [0, 384], sizes = [8, 128], strides = [1, 1]} : vector<8x512xf32> to vector<8x128xf32>
      %189 = arith.mulf %188, %188 : vector<8x128xf32>
      %cst_88 = arith.constant dense<0.000000e+00> : vector<8xf32>
      %190 = vector.multi_reduction <add>, %189, %cst_88 [1] : vector<8x128xf32> to vector<8xf32>
      %191 = vector.shape_cast %190 : vector<8xf32> to vector<8x1xf32>
      %cst_89 = arith.constant 1.280000e+02 : f32
      %192 = vector.broadcast %cst_89 : f32 to vector<8x1xf32>
      %193 = arith.divf %191, %192 : vector<8x1xf32>
      %cst_90 = arith.constant 9.99999997E-7 : f32
      %194 = vector.broadcast %cst_90 : f32 to vector<8x1xf32>
      %195 = arith.addf %193, %194 : vector<8x1xf32>
      %196 = math.rsqrt %195 : vector<8x1xf32>
      %197 = vector.broadcast %196 : vector<8x1xf32> to vector<8x128xf32>
      %198 = arith.mulf %188, %197 : vector<8x128xf32>
      %199 = arith.mulf %198, %135 : vector<8x128xf32>
      %c64_i32_91 = arith.constant 64 : i32
      %200 = tpu.dynamic_rotate %198 by %c64_i32_91 dim 1 : vector<8x128xf32>, i32 -> vector<8x128xf32>
      %201 = arith.mulf %200, %136 : vector<8x128xf32>
      %202 = arith.addf %199, %201 : vector<8x128xf32>
      %203 = arith.truncf %202 : vector<8x128xf32> to vector<8x128xbf16>
      %c24 = arith.constant 24 : index
      %c0_92 = arith.constant 0 : index
      %204 = vector.load %arg13[%c24, %c0_92] : memref<32x128xbf16, #tpu.memory_space<vmem>>, vector<8x128xbf16>
      tpu.vector_store %arg13[%c24, %c0_92], %203 {strides = array<i32>} : memref<32x128xbf16, #tpu.memory_space<vmem>>, vector<8x128xbf16>,
      %cst_93 = arith.constant -1.000000e+30 : f32
      %205 = vector.broadcast %cst_93 : f32 to vector<32x1xf32>
      %c0_94 = arith.constant 0 : index
      %c0_95 = arith.constant 0 : index
      %206 = vector.load %arg14[%c0_94, %c0_95] : memref<32x1xf32, #tpu.memory_space<vmem>>, vector<32x1xf32>
      tpu.vector_store %arg14[%c0_94, %c0_95], %205 {strides = array<i32>} : memref<32x1xf32, #tpu.memory_space<vmem>>, vector<32x1xf32>,
      %cst_96 = arith.constant 0.000000e+00 : f32
      %207 = vector.broadcast %cst_96 : f32 to vector<32x1xf32>
      %c0_97 = arith.constant 0 : index
      %c0_98 = arith.constant 0 : index
      %208 = vector.load %arg15[%c0_97, %c0_98] : memref<32x1xf32, #tpu.memory_space<vmem>>, vector<32x1xf32>
      tpu.vector_store %arg15[%c0_97, %c0_98], %207 {strides = array<i32>} : memref<32x1xf32, #tpu.memory_space<vmem>>, vector<32x1xf32>,
      %cst_99 = arith.constant 0.000000e+00 : f32
      %209 = vector.broadcast %cst_99 : f32 to vector<32x128xf32>
      %c0_100 = arith.constant 0 : index
      %c0_101 = arith.constant 0 : index
      %210 = vector.load %arg16[%c0_100, %c0_101] : memref<32x128xf32, #tpu.memory_space<vmem>>, vector<32x128xf32>
      tpu.vector_store %arg16[%c0_100, %c0_101], %209 {strides = array<i32>} : memref<32x128xf32, #tpu.memory_space<vmem>>, vector<32x128xf32>,
    } else {
    }
    %c0 = arith.constant 0 : index
    %c0_1 = arith.constant 0 : index
    %c0_2 = arith.constant 0 : index
    %3 = vector.load %arg4[%c0, %c0_1, %c0_2] : memref<1x128x128xbf16, #tpu.memory_space<vmem>>, vector<1x128x128xbf16>
    %4 = vector.shape_cast %3 : vector<1x128x128xbf16> to vector<128x128xbf16>
    %c0_3 = arith.constant 0 : index
    %c0_4 = arith.constant 0 : index
    %5 = vector.load %arg6[%c0_3, %c0_4] : memref<128x512xbf16, #tpu.memory_space<vmem>>, vector<128x512xbf16>
    %cst = arith.constant dense<0.000000e+00> : vector<128x512xf32>
    %6 = tpu.matmul %4, %5, %cst {dimension_numbers = #tpu.dot_dimension_numbers<[1], [0], [0], [1], [0, 0, 1, 1], [], []>} : vector<128x128xbf16>, vector<128x512xbf16>, vector<128x512xf32> -> vector<128x512xf32>
    %c0_5 = arith.constant 0 : index
    %c0_6 = arith.constant 0 : index
    %7 = vector.load %arg10[%c0_5, %c0_6] : memref<128x128xf32, #tpu.memory_space<vmem>>, vector<128x128xf32>
    %c0_7 = arith.constant 0 : index
    %c0_8 = arith.constant 0 : index
    %8 = vector.load %arg11[%c0_7, %c0_8] : memref<128x128xf32, #tpu.memory_space<vmem>>, vector<128x128xf32>
    %9 = tpu.iota {dimensions = array<i32: 0>} : vector<16x128xi32>
    %10 = tpu.iota {dimensions = array<i32: 1>} : vector<16x128xi32>
    %c8_i32 = arith.constant 8 : i32
    %11 = arith.muli %arg1, %c8_i32 : i32
    %c8_i32_9 = arith.constant 8 : i32
    %c0_i32_10 = arith.constant 0 : i32
    %12 = arith.cmpi eq, %c8_i32_9, %c0_i32_10 : i32
    %c1_i32 = arith.constant 1 : i32
    %13 = arith.select %12, %c1_i32, %c8_i32_9 : i32
    %14 = vector.broadcast %13 : i32 to vector<16x128xi32>
    %15 = arith.remsi %9, %14 : vector<16x128xi32>
    %c0_i32_11 = arith.constant 0 : i32
    %16 = vector.broadcast %c0_i32_11 : i32 to vector<16x128xi32>
    %17 = arith.cmpi ne, %15, %16 : vector<16x128xi32>
    %c0_i32_12 = arith.constant 0 : i32
    %18 = vector.broadcast %c0_i32_12 : i32 to vector<16x128xi32>
    %19 = arith.cmpi slt, %15, %18 : vector<16x128xi32>
    %c0_i32_13 = arith.constant 0 : i32
    %20 = arith.cmpi slt, %13, %c0_i32_13 : i32
    %21 = vector.broadcast %20 : i1 to vector<16x128xi1>
    %22 = vector.broadcast %21 : vector<16x128xi1> to vector<16x128xi1>
    %23 = arith.xori %19, %22 : vector<16x128xi1>
    %24 = arith.andi %23, %17 : vector<16x128xi1>
    %25 = vector.broadcast %13 : i32 to vector<16x128xi32>
    %26 = arith.addi %15, %25 : vector<16x128xi32>
    %27 = arith.select %24, %26, %15 : vector<16x128xi1>, vector<16x128xi32>
    %28 = vector.broadcast %11 : i32 to vector<16x128xi32>
    %29 = arith.addi %28, %27 : vector<16x128xi32>
    %c128_i32 = arith.constant 128 : i32
    %30 = arith.muli %arg2, %c128_i32 : i32
    %31 = vector.broadcast %30 : i32 to vector<16x128xi32>
    %32 = arith.addi %31, %10 : vector<16x128xi32>
    %33 = arith.cmpi sle, %32, %29 : vector<16x128xi32>
    %c8_i32_14 = arith.constant 8 : i32
    %34 = vector.broadcast %c8_i32_14 : i32 to vector<16x128xi32>
    %35 = arith.cmpi slt, %32, %34 : vector<16x128xi32>
    %36 = arith.andi %33, %35 : vector<16x128xi1>
    %cst_15 = arith.constant 0.000000e+00 : f32
    %cst_16 = arith.constant -1.000000e+30 : f32
    %37 = vector.broadcast %cst_15 : f32 to vector<16x128xf32>
    %38 = vector.broadcast %cst_16 : f32 to vector<16x128xf32>
    %39 = arith.select %36, %37, %38 : vector<16x128xi1>, vector<16x128xf32>
    %40 = vector.extract_strided_slice %6 {offsets = [0, 0], sizes = [128, 128], strides = [1, 1]} : vector<128x512xf32> to vector<128x128xf32>
    %41 = arith.mulf %40, %40 : vector<128x128xf32>
    %cst_17 = arith.constant dense<0.000000e+00> : vector<128xf32>
    %42 = vector.multi_reduction <add>, %41, %cst_17 [1] : vector<128x128xf32> to vector<128xf32>
    %43 = vector.shape_cast %42 : vector<128xf32> to vector<128x1xf32>
    %cst_18 = arith.constant 1.280000e+02 : f32
    %44 = vector.broadcast %cst_18 : f32 to vector<128x1xf32>
    %45 = arith.divf %43, %44 : vector<128x1xf32>
    %cst_19 = arith.constant 9.99999997E-7 : f32
    %46 = vector.broadcast %cst_19 : f32 to vector<128x1xf32>
    %47 = arith.addf %45, %46 : vector<128x1xf32>
    %48 = math.rsqrt %47 : vector<128x1xf32>
    %49 = vector.broadcast %48 : vector<128x1xf32> to vector<128x128xf32>
    %50 = arith.mulf %40, %49 : vector<128x128xf32>
    %51 = arith.mulf %50, %7 : vector<128x128xf32>
    %c64_i32 = arith.constant 64 : i32
    %52 = tpu.dynamic_rotate %50 by %c64_i32 dim 1 : vector<128x128xf32>, i32 -> vector<128x128xf32>
    %53 = arith.mulf %52, %8 : vector<128x128xf32>
    %54 = arith.addf %51, %53 : vector<128x128xf32>
    %55 = arith.truncf %54 : vector<128x128xf32> to vector<128x128xbf16>
    %56 = vector.extract_strided_slice %6 {offsets = [0, 256], sizes = [128, 128], strides = [1, 1]} : vector<128x512xf32> to vector<128x128xf32>
    %57 = arith.truncf %56 : vector<128x128xf32> to vector<128x128xbf16>
    %c0_20 = arith.constant 0 : index
    %c0_21 = arith.constant 0 : index
    %58 = vector.load %arg13[%c0_20, %c0_21] : memref<32x128xbf16, #tpu.memory_space<vmem>>, vector<16x128xbf16>
    "tpu.trace_start"() <{level = 10 : i32, message = "qd,kd->qk"}> : () -> ()
    %cst_22 = arith.constant dense<0.000000e+00> : vector<16x128xf32>
    %59 = tpu.matmul %58, %55, %cst_22 {dimension_numbers = #tpu.dot_dimension_numbers<[1], [1], [0], [0], [0, 0, 1, 0], [], []>} : vector<16x128xbf16>, vector<128x128xbf16>, vector<16x128xf32> -> vector<16x128xf32>
    "tpu.trace_stop"() : () -> ()
    %60 = arith.addf %59, %39 : vector<16x128xf32>
    %c0_23 = arith.constant 0 : index
    %c0_24 = arith.constant 0 : index
    %61 = vector.load %arg14[%c0_23, %c0_24] : memref<32x1xf32, #tpu.memory_space<vmem>>, vector<16x1xf32>
    %cst_25 = arith.constant dense<0xFF800000> : vector<16xf32>
    %62 = vector.multi_reduction <maximumf>, %60, %cst_25 [1] : vector<16x128xf32> to vector<16xf32>
    %63 = vector.shape_cast %62 : vector<16xf32> to vector<16x1xf32>
    %64 = arith.maximumf %61, %63 : vector<16x1xf32>
    %65 = arith.subf %61, %64 : vector<16x1xf32>
    %66 = math.exp %65 : vector<16x1xf32>
    %67 = vector.broadcast %64 : vector<16x1xf32> to vector<16x128xf32>
    %68 = arith.subf %60, %67 : vector<16x128xf32>
    %69 = math.exp %68 : vector<16x128xf32>
    %c0_26 = arith.constant 0 : index
    %c0_27 = arith.constant 0 : index
    %70 = vector.load %arg15[%c0_26, %c0_27] : memref<32x1xf32, #tpu.memory_space<vmem>>, vector<16x1xf32>
    %71 = arith.mulf %66, %70 : vector<16x1xf32>
    %cst_28 = arith.constant dense<0.000000e+00> : vector<16xf32>
    %72 = vector.multi_reduction <add>, %69, %cst_28 [1] : vector<16x128xf32> to vector<16xf32>
    %73 = vector.shape_cast %72 : vector<16xf32> to vector<16x1xf32>
    %74 = arith.addf %71, %73 : vector<16x1xf32>
    %c0_29 = arith.constant 0 : index
    %c0_30 = arith.constant 0 : index
    %75 = vector.load %arg15[%c0_29, %c0_30] : memref<32x1xf32, #tpu.memory_space<vmem>>, vector<16x1xf32>
    tpu.vector_store %arg15[%c0_29, %c0_30], %74 {strides = array<i32>} : memref<32x1xf32, #tpu.memory_space<vmem>>, vector<16x1xf32>,
    %c0_31 = arith.constant 0 : index
    %c0_32 = arith.constant 0 : index
    %76 = vector.load %arg16[%c0_31, %c0_32] : memref<32x128xf32, #tpu.memory_space<vmem>>, vector<16x128xf32>
    %77 = vector.broadcast %66 : vector<16x1xf32> to vector<16x128xf32>
    %78 = arith.mulf %77, %76 : vector<16x128xf32>
    %79 = arith.truncf %69 : vector<16x128xf32> to vector<16x128xbf16>
    %cst_33 = arith.constant dense<0.000000e+00> : vector<16x128xf32>
    %80 = tpu.matmul %79, %57, %cst_33 {dimension_numbers = #tpu.dot_dimension_numbers<[1], [0], [0], [1], [0, 0, 1, 1], [], []>} : vector<16x128xbf16>, vector<128x128xbf16>, vector<16x128xf32> -> vector<16x128xf32>
    %81 = arith.addf %78, %80 : vector<16x128xf32>
    %c0_34 = arith.constant 0 : index
    %c0_35 = arith.constant 0 : index
    %82 = vector.load %arg16[%c0_34, %c0_35] : memref<32x128xf32, #tpu.memory_space<vmem>>, vector<16x128xf32>
    tpu.vector_store %arg16[%c0_34, %c0_35], %81 {strides = array<i32>} : memref<32x128xf32, #tpu.memory_space<vmem>>, vector<16x128xf32>,
    %c0_36 = arith.constant 0 : index
    %c0_37 = arith.constant 0 : index
    %83 = vector.load %arg14[%c0_36, %c0_37] : memref<32x1xf32, #tpu.memory_space<vmem>>, vector<16x1xf32>
    tpu.vector_store %arg14[%c0_36, %c0_37], %64 {strides = array<i32>} : memref<32x1xf32, #tpu.memory_space<vmem>>, vector<16x1xf32>,
    %84 = vector.extract_strided_slice %6 {offsets = [0, 128], sizes = [128, 128], strides = [1, 1]} : vector<128x512xf32> to vector<128x128xf32>
    %85 = arith.mulf %84, %84 : vector<128x128xf32>
    %cst_38 = arith.constant dense<0.000000e+00> : vector<128xf32>
    %86 = vector.multi_reduction <add>, %85, %cst_38 [1] : vector<128x128xf32> to vector<128xf32>
    %87 = vector.shape_cast %86 : vector<128xf32> to vector<128x1xf32>
    %cst_39 = arith.constant 1.280000e+02 : f32
    %88 = vector.broadcast %cst_39 : f32 to vector<128x1xf32>
    %89 = arith.divf %87, %88 : vector<128x1xf32>
    %cst_40 = arith.constant 9.99999997E-7 : f32
    %90 = vector.broadcast %cst_40 : f32 to vector<128x1xf32>
    %91 = arith.addf %89, %90 : vector<128x1xf32>
    %92 = math.rsqrt %91 : vector<128x1xf32>
    %93 = vector.broadcast %92 : vector<128x1xf32> to vector<128x128xf32>
    %94 = arith.mulf %84, %93 : vector<128x128xf32>
    %95 = arith.mulf %94, %7 : vector<128x128xf32>
    %c64_i32_41 = arith.constant 64 : i32
    %96 = tpu.dynamic_rotate %94 by %c64_i32_41 dim 1 : vector<128x128xf32>, i32 -> vector<128x128xf32>
    %97 = arith.mulf %96, %8 : vector<128x128xf32>
    %98 = arith.addf %95, %97 : vector<128x128xf32>
    %99 = arith.truncf %98 : vector<128x128xf32> to vector<128x128xbf16>
    %100 = vector.extract_strided_slice %6 {offsets = [0, 384], sizes = [128, 128], strides = [1, 1]} : vector<128x512xf32> to vector<128x128xf32>
    %101 = arith.truncf %100 : vector<128x128xf32> to vector<128x128xbf16>
    %c16 = arith.constant 16 : index
    %c0_42 = arith.constant 0 : index
    %102 = vector.load %arg13[%c16, %c0_42] : memref<32x128xbf16, #tpu.memory_space<vmem>>, vector<16x128xbf16>
    "tpu.trace_start"() <{level = 10 : i32, message = "qd,kd->qk"}> : () -> ()
    %cst_43 = arith.constant dense<0.000000e+00> : vector<16x128xf32>
    %103 = tpu.matmul %102, %99, %cst_43 {dimension_numbers = #tpu.dot_dimension_numbers<[1], [1], [0], [0], [0, 0, 1, 0], [], []>} : vector<16x128xbf16>, vector<128x128xbf16>, vector<16x128xf32> -> vector<16x128xf32>
    "tpu.trace_stop"() : () -> ()
    %104 = arith.addf %103, %39 : vector<16x128xf32>
    %c16_44 = arith.constant 16 : index
    %c0_45 = arith.constant 0 : index
    %105 = vector.load %arg14[%c16_44, %c0_45] : memref<32x1xf32, #tpu.memory_space<vmem>>, vector<16x1xf32>
    %cst_46 = arith.constant dense<0xFF800000> : vector<16xf32>
    %106 = vector.multi_reduction <maximumf>, %104, %cst_46 [1] : vector<16x128xf32> to vector<16xf32>
    %107 = vector.shape_cast %106 : vector<16xf32> to vector<16x1xf32>
    %108 = arith.maximumf %105, %107 : vector<16x1xf32>
    %109 = arith.subf %105, %108 : vector<16x1xf32>
    %110 = math.exp %109 : vector<16x1xf32>
    %111 = vector.broadcast %108 : vector<16x1xf32> to vector<16x128xf32>
    %112 = arith.subf %104, %111 : vector<16x128xf32>
    %113 = math.exp %112 : vector<16x128xf32>
    %c16_47 = arith.constant 16 : index
    %c0_48 = arith.constant 0 : index
    %114 = vector.load %arg15[%c16_47, %c0_48] : memref<32x1xf32, #tpu.memory_space<vmem>>, vector<16x1xf32>
    %115 = arith.mulf %110, %114 : vector<16x1xf32>
    %cst_49 = arith.constant dense<0.000000e+00> : vector<16xf32>
    %116 = vector.multi_reduction <add>, %113, %cst_49 [1] : vector<16x128xf32> to vector<16xf32>
    %117 = vector.shape_cast %116 : vector<16xf32> to vector<16x1xf32>
    %118 = arith.addf %115, %117 : vector<16x1xf32>
    %c16_50 = arith.constant 16 : index
    %c0_51 = arith.constant 0 : index
    %119 = vector.load %arg15[%c16_50, %c0_51] : memref<32x1xf32, #tpu.memory_space<vmem>>, vector<16x1xf32>
    tpu.vector_store %arg15[%c16_50, %c0_51], %118 {strides = array<i32>} : memref<32x1xf32, #tpu.memory_space<vmem>>, vector<16x1xf32>,
    %c16_52 = arith.constant 16 : index
    %c0_53 = arith.constant 0 : index
    %120 = vector.load %arg16[%c16_52, %c0_53] : memref<32x128xf32, #tpu.memory_space<vmem>>, vector<16x128xf32>
    %121 = vector.broadcast %110 : vector<16x1xf32> to vector<16x128xf32>
    %122 = arith.mulf %121, %120 : vector<16x128xf32>
    %123 = arith.truncf %113 : vector<16x128xf32> to vector<16x128xbf16>
    %cst_54 = arith.constant dense<0.000000e+00> : vector<16x128xf32>
    %124 = tpu.matmul %123, %101, %cst_54 {dimension_numbers = #tpu.dot_dimension_numbers<[1], [0], [0], [1], [0, 0, 1, 1], [], []>} : vector<16x128xbf16>, vector<128x128xbf16>, vector<16x128xf32> -> vector<16x128xf32>
    %125 = arith.addf %122, %124 : vector<16x128xf32>
    %c16_55 = arith.constant 16 : index
    %c0_56 = arith.constant 0 : index
    %126 = vector.load %arg16[%c16_55, %c0_56] : memref<32x128xf32, #tpu.memory_space<vmem>>, vector<16x128xf32>
    tpu.vector_store %arg16[%c16_55, %c0_56], %125 {strides = array<i32>} : memref<32x128xf32, #tpu.memory_space<vmem>>, vector<16x128xf32>,
    %c16_57 = arith.constant 16 : index
    %c0_58 = arith.constant 0 : index
    %127 = vector.load %arg14[%c16_57, %c0_58] : memref<32x1xf32, #tpu.memory_space<vmem>>, vector<16x1xf32>
    tpu.vector_store %arg14[%c16_57, %c0_58], %108 {strides = array<i32>} : memref<32x1xf32, #tpu.memory_space<vmem>>, vector<16x1xf32>,
    %c0_i32_59 = arith.constant 0 : i32
    %128 = arith.cmpi eq, %arg2, %c0_i32_59 : i32
    %129 = arith.extui %128 : i1 to i32
    %c0_i32_60 = arith.constant 0 : i32
    %130 = arith.cmpi ne, %129, %c0_i32_60 : i32
    scf.if %130 {
      %c0_61 = arith.constant 0 : index
      %c0_62 = arith.constant 0 : index
      %131 = vector.load %arg16[%c0_61, %c0_62] : memref<32x128xf32, #tpu.memory_space<vmem>>, vector<32x128xf32>
      %c0_63 = arith.constant 0 : index
      %c0_64 = arith.constant 0 : index
      %132 = vector.load %arg15[%c0_63, %c0_64] : memref<32x1xf32, #tpu.memory_space<vmem>>, vector<32x1xf32>
      %133 = tpu.reciprocal %132 {approx = true} : vector<32x1xf32> -> vector<32x1xf32>
      %134 = vector.broadcast %133 : vector<32x1xf32> to vector<32x128xf32>
      %135 = arith.mulf %131, %134 : vector<32x128xf32>
      %136 = vector.extract_strided_slice %135 {offsets = [0, 0], sizes = [8, 128], strides = [1, 1]} : vector<32x128xf32> to vector<8x128xf32>
      %137 = vector.extract_strided_slice %135 {offsets = [8, 0], sizes = [8, 128], strides = [1, 1]} : vector<32x128xf32> to vector<8x128xf32>
      %138 = vector.extract_strided_slice %135 {offsets = [16, 0], sizes = [8, 128], strides = [1, 1]} : vector<32x128xf32> to vector<8x128xf32>
      %139 = vector.extract_strided_slice %135 {offsets = [24, 0], sizes = [8, 128], strides = [1, 1]} : vector<32x128xf32> to vector<8x128xf32>
      %140 = tpu.concatenate %136, %137, %138, %139 in 1 : vector<8x128xf32>, vector<8x128xf32>, vector<8x128xf32>, vector<8x128xf32> -> vector<8x512xf32>
      %141 = arith.truncf %140 : vector<8x512xf32> to vector<8x512xbf16>
      %c0_65 = arith.constant 0 : index
      %c0_66 = arith.constant 0 : index
      %142 = vector.load %arg7[%c0_65, %c0_66] : memref<512x128xbf16, #tpu.memory_space<vmem>>, vector<512x128xbf16>
      %cst_67 = arith.constant dense<0.000000e+00> : vector<8x128xf32>
      %143 = tpu.matmul %141, %142, %cst_67 {dimension_numbers = #tpu.dot_dimension_numbers<[1], [0], [0], [1], [0, 0, 1, 1], [], []>} : vector<8x512xbf16>, vector<512x128xbf16>, vector<8x128xf32> -> vector<8x128xf32>
      %c0_68 = arith.constant 0 : index
      %c0_69 = arith.constant 0 : index
      %c0_70 = arith.constant 0 : index
      %144 = vector.load %arg12[%c0_68, %c0_69, %c0_70] : memref<1x8x128xf32, #tpu.memory_space<vmem>>, vector<1x8x128xf32>
      %145 = vector.shape_cast %144 : vector<1x8x128xf32> to vector<8x128xf32>
      %146 = vector.shape_cast %143 : vector<8x128xf32> to vector<1x8x128xf32>
      tpu.vector_store %arg12[%c0_68, %c0_69, %c0_70], %146 {strides = array<i32>} : memref<1x8x128xf32, #tpu.memory_space<vmem>>, vector<1x8x128xf32>,
    } else {
    }
    return
  }
  func.func @transform_0(%arg0: i32, %arg1: i32, %arg2: i32) -> (i32, i32, i32) {
    %c0_i32 = arith.constant 0 : i32
    %c0_i32_0 = arith.constant 0 : i32
    return %arg0, %arg1, %c0_i32 : i32, i32, i32
  }
  func.func @transform_1(%arg0: i32, %arg1: i32, %arg2: i32) -> (i32, i32, i32) {
    %c0_i32 = arith.constant 0 : i32
    %c0_i32_0 = arith.constant 0 : i32
    return %arg0, %arg2, %c0_i32 : i32, i32, i32
  }
  func.func @transform_2(%arg0: i32, %arg1: i32, %arg2: i32) -> (i32, i32) {
    %c0_i32 = arith.constant 0 : i32
    %c0_i32_0 = arith.constant 0 : i32
    %c0_i32_1 = arith.constant 0 : i32
    return %c0_i32, %c0_i32_0 : i32, i32
  }
  func.func @transform_3(%arg0: i32, %arg1: i32, %arg2: i32) -> (i32, i32) {
    %c0_i32 = arith.constant 0 : i32
    %c0_i32_0 = arith.constant 0 : i32
    %c0_i32_1 = arith.constant 0 : i32
    return %c0_i32, %c0_i32_0 : i32, i32
  }
  func.func @transform_4(%arg0: i32, %arg1: i32, %arg2: i32) -> (i32, i32) {
    %c0_i32 = arith.constant 0 : i32
    %c0_i32_0 = arith.constant 0 : i32
    %c0_i32_1 = arith.constant 0 : i32
    return %c0_i32, %c0_i32_0 : i32, i32
  }
  func.func @transform_5(%arg0: i32, %arg1: i32, %arg2: i32) -> (i32, i32) {
    %c0_i32 = arith.constant 0 : i32
    %c0_i32_0 = arith.constant 0 : i32
    return %arg1, %c0_i32 : i32, i32
  }
  func.func @transform_6(%arg0: i32, %arg1: i32, %arg2: i32) -> (i32, i32) {
    %c0_i32 = arith.constant 0 : i32
    %c0_i32_0 = arith.constant 0 : i32
    return %arg1, %c0_i32 : i32, i32
  }
  func.func @transform_7(%arg0: i32, %arg1: i32, %arg2: i32) -> (i32, i32) {
    %c0_i32 = arith.constant 0 : i32
    %c0_i32_0 = arith.constant 0 : i32
    return %arg2, %c0_i32 : i32, i32
  }
  func.func @transform_8(%arg0: i32, %arg1: i32, %arg2: i32) -> (i32, i32) {
    %c0_i32 = arith.constant 0 : i32
    %c0_i32_0 = arith.constant 0 : i32
    return %arg2, %c0_i32 : i32, i32
  }
  func.func @transform_9(%arg0: i32, %arg1: i32, %arg2: i32) -> (i32, i32, i32) {
    %c0_i32 = arith.constant 0 : i32
    %c0_i32_0 = arith.constant 0 : i32
    return %arg0, %arg1, %c0_i32 : i32, i32, i32
  }
}

</mosaic_0001>

<bundles_post_ra>
// kernel: tpu_custom_call.1
= control target key start
LH: loop header
LB: loop body
LE: loop exit
PB: predicated region body
PF: predicated region fallthrough
CT: control target
= control target key end

     0   :  { %s4879_s0 = inlined_call_operand.hbm [shape: bf16[2,8,128], index: 0, kind: input, shape index: {}]   ;;  %s4880_s1 = inlined_call_operand.hbm [shape: bf16[2,128,128], index: 1, kind: input, shape index: {}]   ;;  %s4881_s2 = inlined_call_operand.hbm [shape: bf16[128,512], index: 2, kind: input, shape index: {}]   ;;  %s4882_s3 = inlined_call_operand.hbm [shape: bf16[128,512], index: 3, kind: input, shape index: {}]   ;;  %s4883_s4 = inlined_call_operand.hbm [shape: bf16[512,128], index: 4, kind: input, shape index: {}]   ;;  %s4884_s5 = inlined_call_operand.vmem [shape: f32[8,128], index: 5, kind: input, shape index: {}]   ;;  %s4885_s6 = inlined_call_operand.vmem [shape: f32[8,128], index: 6, kind: input, shape index: {}]   ;;  %s4886_s7 = inlined_call_operand.hbm [shape: f32[128,128], index: 7, kind: input, shape index: {}]   ;;  %s4887_s8 = inlined_call_operand.hbm [shape: f32[128,128], index: 8, kind: input, shape index: {}]   ;;  %s4888_s9 = inlined_call_operand.hbm [shape: f32[2,8,128], index: 9, kind: output, shape index: {}]  }
   0x1   :  { %4913 = sst [smem:[#allocation38_spill]] %s4879_s0 }
   0x2   :  { %4914 = sst [smem:[#allocation39_spill]] %s4881_s2 }
   0x3   :  { %4915 = sst [smem:[#allocation40_spill]] %s4882_s3 }
   0x4   :  { %4916 = sst [smem:[#allocation41_spill]] %s4883_s4 }
   0x5   :  { %4917 = sst [smem:[#allocation42_spill]] %s4884_s5 }
   0x6   :  { %4918 = sst [smem:[#allocation43_spill]] %s4888_s9 }
   0x7   :  { %14 = vsyncpa [#allocation7], 0 }
   0x8   :  { %16 = vsyncpa [#allocation7 + $0x1], 0 }
   0x9   :  { %17 = vsyncpa [#allocation10], 0 }
   0xa   :  { %19 = vsyncpa [#allocation10 + $0x1], 0 }
   0xb   :  { %20 = vsyncpa [#allocation13], 0 }
   0xc   :  { %21 = vsyncpa [#allocation16], 0 }
   0xd   :  { %22 = vsyncpa [#allocation8], 0 }
   0xe   :  { %24 = vsyncpa [#allocation8 + $0x1], 0  ;;  %s3785_s30 = smov 0   ;;  %s3787_s10 = smov 0  }
   0xf   :  { %s3789_s11 = smov 0   ;;  %s3791_s12 = smov 0  }
  0x10   :  { %s3793_s13 = smov 0   ;;  %s3795_s14 = smov 0  }
  0x11 LB: > { %4919 = sst [smem:[#allocation25_spill]] %s3706_s12  ;;  %s3816_s15 = sadd.s32 4294967295, %s3714_s14   ;;  %s3714_s14 = sphi %s3795_s14, %s30_s14   ;;  %s3710_s13 = sphi %s3793_s13, %s4981_s13   ;;  %s3706_s12 = sphi %s3791_s12, %s4980_s12   ;;  %s3702_s11 = sphi %s3789_s11, %s4979_s11   ;;  %s3698_s10 = sphi %s3787_s10, %s4978_s10   ;;  %s3694_s30 = sphi %s3785_s30, %s4977_s30  }
  0x12   : > { %p2753_p0 = scmp.ge.s32.totalorder %s3714_s14, 1  ;;  %p4890_p1 = scmp.eq.s32.totalorder %s3816_s15, 0 }
  0x13   : > { %p305_p2 = scmp.lt.s32.totalorder %s3714_s14, 3  ;;  %s3716_s17 = smov [#allocation11]  }
  0x14   : > { %s317_s18 = sshll.u32 %s3716_s17, 4  ;;  %s3717_s20 = smov [#allocation12]   ;;  %s3825_s18 = int_to_ptr.vmem [resolvable:$true] %s317_s18 }
  0x15   : > { %p3821_p3 = pnand %p2753_p0, %p305_p2  ;;  %s330_s21 = sshll.u32 %s3717_s20, 4  ;;  %s3836_s21 = int_to_ptr.vmem [resolvable:$true] %s330_s21 }
  0x16   : > { %s3718_s22 = smov [#allocation15]   ;;  %s4922_s2 = sld [smem:[#allocation39_spill]] }
  0x17   : > { %s4920_s16 = scalar_select %p3821_p3, 1, 0 }
  0x18   : > { %p3071_p4 = pneg %p3821_p3  ;;  %s3838_s23 = sshll.u32 %s3718_s22, 4  ;;  %s374_s23 = int_to_ptr.vmem [resolvable:$true] %s3838_s23 }
  0x1a   : > { %p3832_p6 = pnand %p3071_p4, %p4890_p1 }
  0x1c   : > { %s3416_s26 = scalar_lea.hbm %s4922_s2, 4096  ;;  %p3848_p8 = pneg %p3832_p6 }
  0x1d   : > { %p3417_p7 = scmp.ne.s32.totalorder %s4922_s2, %s3416_s26  ;;  %p3423_p11 = scmp.lt.u32.totalorder %s3416_s26, %s4922_s2 }
  0x1f   : > { %p3419_p9 = pnand %p3848_p8, %p3417_p7 }
  0x21   : > { %p3420_p10 = pneg %p3419_p9 }
  0x23   : > { %p3425_p12 = pnand %p3423_p11, %p3420_p10 }
  0x25   : > { %3428 = shalt.err (!%p3425_p12)
}
  0x26   : > { %s3429_s22 = scalar_lea.vmem %s3825_s18, 4096  ;;  %p3437_p4 = scmp.lt.s32.totalorder %s3825_s18, %s3825_s18 }
  0x27   : > { %p3430_p13 = scmp.ne.s32.totalorder %s3825_s18, %s3429_s22  ;;  %p3438_p5 = scmp.lt.s32.totalorder %s3429_s22, %s3429_s22 }
  0x29   : > { %p3432_p0 = pnand %p3430_p13, %p3848_p8  ;;  %p3439_p7 = por %p3438_p5, %p3437_p4 }
  0x2b   : > { %p3433_p2 = pneg %p3432_p0 }
  0x2d   : > { %p3440_p9 = pnand %p3439_p7, %p3433_p2 }
  0x2f   : > { %3443 = shalt.err (!%p3440_p9)
}
  0x30   : > { %s3719_s24 = smov 256   ;;  %s3720_s25 = smov 16  }
  0x31   : > { %3074 = dma.hbm_to_vmem [thread:$0]  (!%p3832_p6), %s4922_s2, 4096, %s3825_s18, [#allocation10], %s3719_s24, %s3719_s24, %s3720_s25  }
  0x32   : > { %s4924_s3 = sld [smem:[#allocation40_spill]] }
  0x38   : > { %s3444_s20 = scalar_lea.hbm %s4924_s3, 4096 }
  0x39   : > { %p3445_p5 = scmp.ne.s32.totalorder %s4924_s3, %s3444_s20  ;;  %p3451_p12 = scmp.lt.u32.totalorder %s3444_s20, %s4924_s3 }
  0x3b   : > { %p3447_p10 = pnand %p3445_p5, %p3848_p8 }
  0x3d   : > { %p3448_p11 = pneg %p3447_p10 }
  0x3f   : > { %p3453_p13 = pnand %p3451_p12, %p3448_p11 }
  0x41   : > { %3456 = shalt.err (!%p3453_p13)
}
  0x42   : > { %s3457_s18 = scalar_lea.vmem %s3836_s21, 4096  ;;  %p3465_p7 = scmp.lt.s32.totalorder %s3836_s21, %s3836_s21 }
  0x43   : > { %p3458_p0 = scmp.ne.s32.totalorder %s3836_s21, %s3457_s18  ;;  %p3466_p9 = scmp.lt.s32.totalorder %s3457_s18, %s3457_s18 }
  0x45   : > { %p3460_p2 = pnand %p3458_p0, %p3848_p8  ;;  %p3467_p5 = por %p3466_p9, %p3465_p7 }
  0x47   : > { %p3461_p4 = pneg %p3460_p2 }
  0x49   : > { %p3468_p10 = pnand %p3467_p5, %p3461_p4 }
  0x4b   : > { %3471 = shalt.err (!%p3468_p10)
}
  0x4c   : > { %3077 = dma.hbm_to_vmem [thread:$0]  (!%p3832_p6), %s4924_s3, 4096, %s3836_s21, [#allocation13], %s3719_s24, %s3719_s24, %s3720_s25  }
  0x4d   : > { %s3472_s27 = scalar_lea.hbm %s4886_s7, 2048 }
  0x4e   : > { %p3473_p11 = scmp.ne.s32.totalorder %s4886_s7, %s3472_s27  ;;  %p3479_p0 = scmp.lt.u32.totalorder %s3472_s27, %s4886_s7 }
  0x50   : > { %p3475_p12 = pnand %p3473_p11, %p3848_p8 }
  0x52   : > { %p3476_p13 = pneg %p3475_p12 }
  0x54   : > { %p3481_p2 = pnand %p3479_p0, %p3476_p13 }
  0x56   : > { %3484 = shalt.err (!%p3481_p2)
}
  0x57   : > { %s3485_s18 = scalar_lea.vmem %s374_s23, 2048  ;;  %p3493_p5 = scmp.lt.s32.totalorder %s374_s23, %s374_s23 }
  0x58   : > { %p3486_p4 = scmp.ne.s32.totalorder %s374_s23, %s3485_s18  ;;  %p3494_p10 = scmp.lt.s32.totalorder %s3485_s18, %s3485_s18 }
  0x5a   : > { %p3488_p7 = pnand %p3486_p4, %p3848_p8  ;;  %p3495_p1 = por %p3494_p10, %p3493_p5 }
  0x5c   : > { %p3489_p9 = pneg %p3488_p7 }
  0x5e   : > { %p3496_p3 = pnand %p3495_p1, %p3489_p9 }
  0x60   : > { %3499 = shalt.err (!%p3496_p3)
}
  0x61   : > { %s4892_s21 = smov 128   ;;  %s4893_s24 = smov 8  }
  0x62   : > { %3083 = dma.hbm_to_vmem [thread:$0]  (!%p3832_p6), %s4886_s7, 2048, %s374_s23, [#allocation16], %s4892_s21, %s4892_s21, %s4893_s24  }
  0x63   : > { %s3723_s9 = smov [#allocation14]   ;;  %s4925_s4 = sld [smem:[#allocation41_spill]] }
  0x64   : > { %s343_s12 = sshll.u32 %s3723_s9, 4  ;;  %s344_s12 = int_to_ptr.vmem [resolvable:$true] %s343_s12 }
  0x69   : > { %s3500_s28 = scalar_lea.hbm %s4925_s4, 4096 }
  0x6a   : > { %p3501_p1 = scmp.ne.s32.totalorder %s4925_s4, %s3500_s28  ;;  %p3507_p12 = scmp.lt.u32.totalorder %s3500_s28, %s4925_s4 }
  0x6c   : > { %p3503_p3 = pnand %p3501_p1, %p3848_p8 }
  0x6e   : > { %p3504_p11 = pneg %p3503_p3 }
  0x70   : > { %p3509_p13 = pnand %p3507_p12, %p3504_p11 }
  0x72   : > { %3512 = shalt.err (!%p3509_p13)
}
  0x73   : > { %s3513_s23 = scalar_lea.vmem %s344_s12, 4096  ;;  %p3521_p7 = scmp.lt.s32.totalorder %s344_s12, %s344_s12 }
  0x74   : > { %p3514_p0 = scmp.ne.s32.totalorder %s344_s12, %s3513_s23  ;;  %p3522_p9 = scmp.lt.s32.totalorder %s3513_s23, %s3513_s23 }
  0x76   : > { %p3516_p2 = pnand %p3514_p0, %p3848_p8  ;;  %p3523_p5 = por %p3522_p9, %p3521_p7 }
  0x78   : > { %p3517_p4 = pneg %p3516_p2 }
  0x7a   : > { %p3524_p10 = pnand %p3523_p5, %p3517_p4 }
  0x7c   : > { %3527 = shalt.err (!%p3524_p10)
}
  0x7d   : > { %s4894_s25 = smov 64   ;;  %s4895_s5 = smov 4  }
  0x7e   : > { %3080 = dma.hbm_to_vmem [thread:$0]  (!%p3832_p6), %s4925_s4, 4096, %s344_s12, [#allocation13], %s4894_s25, %s4894_s25, %s4895_s5  }
  0x7f   : > { %s3726_s27 = smov [#allocation17]   ;;  %s3528_s22 = scalar_lea.hbm %s4887_s8, 2048 }
  0x80   : > { %s389_s28 = sshll.u32 %s3726_s27, 4  ;;  %p3529_p1 = scmp.ne.s32.totalorder %s4887_s8, %s3528_s22  ;;  %s390_s28 = int_to_ptr.vmem [resolvable:$true] %s389_s28 }
  0x81   : > { %p3535_p12 = scmp.lt.u32.totalorder %s3528_s22, %s4887_s8 }
  0x82   : > { %p3531_p3 = pnand %p3529_p1, %p3848_p8 }
  0x84   : > { %p3532_p11 = pneg %p3531_p3 }
  0x86   : > { %p3537_p13 = pnand %p3535_p12, %p3532_p11 }
  0x88   : > { %3540 = shalt.err (!%p3537_p13)
}
  0x89   : > { %s3541_s12 = scalar_lea.vmem %s390_s28, 2048  ;;  %p3549_p7 = scmp.lt.s32.totalorder %s390_s28, %s390_s28 }
  0x8a   : > { %p3542_p0 = scmp.ne.s32.totalorder %s390_s28, %s3541_s12  ;;  %p3550_p9 = scmp.lt.s32.totalorder %s3541_s12, %s3541_s12 }
  0x8c   : > { %p3544_p2 = pnand %p3542_p0, %p3848_p8  ;;  %p3551_p5 = por %p3550_p9, %p3549_p7 }
  0x8e   : > { %p3545_p4 = pneg %p3544_p2 }
  0x90   : > { %p3552_p10 = pnand %p3551_p5, %p3545_p4 }
  0x92   : > { %3555 = shalt.err (!%p3552_p10)
}
  0x93   : > { %s4926_s9 = smov 8   ;;  %s4927_s26 = smov 128  }
  0x94   : > { %3086 = dma.hbm_to_vmem [thread:$0]  (!%p3832_p6), %s4887_s8, 2048, %s390_s28, [#allocation16], %s4927_s26, %s4927_s26, %s4926_s9  }
  0x95   : > { %s2752_s19 = sadd.s32 4294967294, %s3714_s14   ;;  %s49_s29 = sadd.s32 1, %s3710_s13 }
  0x96   : > { %s58_s27 = sadd.s32 1, %s3702_s11  ;;  %p51_p8 = scmp.ge.s32.totalorder %s49_s29, 2 }
  0x97   : > { %p65_p1 = scmp.ne.s32.totalorder %s3702_s11, %s3698_s10  ;;  %p66_p3 = scmp.eq.s32.totalorder %s3714_s14, 0 }
  0x98   : > { %p71_p11 = scmp.ne.s32.totalorder %s3698_s10, %s3694_s30  ;;  %s4983_s29 = smov (%p51_p8, %s49_s29), 0 }
  0x99   : > { %p3966_p12 = por %p66_p3, %p65_p1  ;;  %p4929_p13 = scmp.eq.s32.totalorder %s3816_s15, 0 }
  0x9a   : > { %s53_s20 = ssub.s32 %s3710_s13, %s4983_s29  ;;  %p292_p0 = scmp.eq.s32.totalorder %s3816_s15, 1 }
  0x9b   : > { %p3972_p6 = por %p4929_p13, %p71_p11  ;;  %p56_p2 = scmp.eq.s32.totalorder %s53_s20, 0 }
  0x9c   : > { %p298_p4 = scmp.eq.s32.totalorder %s2752_s19, 1  ;;  %p3979_p7 = por %p292_p0, %p65_p1 }
  0x9d   : > { %p3103_p9 = scmp.lt.s32.totalorder %s3714_s14, 2  ;;  %s3992_s12 = sand.u32 1, %s3702_s11  }
  0x9e   : > { %s4931_s22 = scalar_select %p3979_p7, 1, 0 }
  0x9f   : > { %s3985_s18 = scalar_select %p56_p2, %s3702_s11, %s58_s27  }
  0xa0   : > { %p3987_p5 = por %p298_p4, %p71_p11  ;;  %s2762_s9 = sshll.u32 %s3992_s12, 2 }
  0xa1   : > { %s2763_s26 = sshll.u32 %s3710_s13, 6  ;;  %s4933_s0 = sld [smem:[#allocation38_spill]] }
  0xa2   : > { %s4932_s23 = scalar_select %p3987_p5, 1, 0 }
  0xa3   : > { %s407_s27 = scalar_lea.vmem [#allocation6], %s2762_s9  ;;  %p4005_p10 = pnand %p3103_p9, %p3966_p12 }
  0xa4   : > { %s415_s20 = sshll.u32 %s407_s27, 4  ;;  %s2764_s5 = sshll.u32 %s3992_s12, 6  ;;  %s4001_s20 = int_to_ptr.vmem [resolvable:$true] %s415_s20 }
  0xa5   : > { %s404_s21 = scalar_lea.sflag [#allocation7], %s3992_s12  ;;  %p3558_p1 = pneg %p4005_p10 }
  0xa7   : > { %s3999_s19 = scalar_lea.hbm %s4933_s0, %s2763_s26  ;;  %s3561_s17 = scalar_lea.hbm %s4933_s0, 128 }
  0xa8   : > { %s3556_s26 = scalar_lea.hbm %s3999_s19, 64  ;;  %p3562_p12 = scmp.lt.u32.totalorder %s3999_s19, %s4933_s0 }
  0xa9   : > { %p3557_p8 = scmp.ne.s32.totalorder %s3999_s19, %s3556_s26  ;;  %p3563_p13 = scmp.lt.u32.totalorder %s3561_s17, %s3556_s26 }
  0xaa   : > { %p3565_p2 = scmp.lt.u32.totalorder %s3556_s26, %s3999_s19 }
  0xab   : > { %p3559_p3 = pnand %p3558_p1, %p3557_p8  ;;  %p3564_p0 = por %p3563_p13, %p3562_p12 }
  0xad   : > { %p3560_p11 = pneg %p3559_p3  ;;  %p3566_p4 = por %p3565_p2, %p3564_p0 }
  0xaf   : > { %p3567_p9 = pnand %p3566_p4, %p3560_p11 }
  0xb1   : > { %3570 = shalt.err (!%p3567_p9)
}
  0xb2   : > { %s3571_s2 = scalar_lea.vmem %s4001_s20, 64  ;;  %s3727_s9 = smov [#allocation6]  }
  0xb3   : > { %p3572_p8 = scmp.ne.s32.totalorder %s4001_s20, %s3571_s2  ;;  %s3576_s24 = sshll.u32 %s3727_s9, 4  ;;  %s3577_s24 = int_to_ptr.vmem [resolvable:$false] %s3576_s24 }
  0xb4   : > { %s3578_s3 = scalar_lea.vmem %s3577_s24, 128  ;;  %p3579_p7 = scmp.lt.s32.totalorder %s4001_s20, %s3577_s24 }
  0xb5   : > { %p3574_p3 = pnand %p3572_p8, %p3558_p1  ;;  %p3580_p12 = scmp.lt.s32.totalorder %s3578_s3, %s3571_s2 }
  0xb7   : > { %p3575_p5 = pneg %p3574_p3  ;;  %p3581_p13 = por %p3580_p12, %p3579_p7 }
  0xb9   : > { %p3582_p0 = pnand %p3581_p13, %p3575_p5 }
  0xbb   : > { %3585 = shalt.err (!%p3582_p0)
}
  0xbc   : > { %3090 = dma.hbm_to_vmem [thread:$0]  (!%p4005_p10), %s3999_s19, 64, %s4001_s20, %s404_s21  }
  0xbd   : > { %s426_s26 = scalar_lea.vmem [#allocation9], %s2764_s5  ;;  %s422_s27 = sand.u32 1, %s3714_s14  }
  0xbe   : > { %s435_s17 = sshll.u32 %s426_s26, 4  ;;  %s4935_s9 = sshll.u32 %s3710_s13, 10  ;;  %s4040_s17 = int_to_ptr.vmem [resolvable:$true] %s435_s17 }
  0xbf   : > { %s4047_s3 = scalar_lea.hbm %s4880_s1, %s4935_s9  ;;  %s4049_s0 = scalar_lea.sflag [#allocation10], %s422_s27 }
  0xc0   : > { %s3586_s4 = scalar_lea.hbm %s4047_s3, 1024  ;;  %s3591_s19 = scalar_lea.hbm %s4880_s1, 2048 }
  0xc1   : > { %p3587_p7 = scmp.ne.s32.totalorder %s4047_s3, %s3586_s4  ;;  %p3592_p2 = scmp.lt.u32.totalorder %s4047_s3, %s4880_s1 }
  0xc2   : > { %p3593_p4 = scmp.lt.u32.totalorder %s3591_s19, %s3586_s4  ;;  %p3595_p8 = scmp.lt.u32.totalorder %s3586_s4, %s4047_s3 }
  0xc3   : > { %p3589_p5 = pnand %p3587_p7, %p3558_p1 }
  0xc4   : > { %p3594_p9 = por %p3593_p4, %p3592_p2 }
  0xc5   : > { %p3590_p11 = pneg %p3589_p5 }
  0xc6   : > { %p3596_p3 = por %p3595_p8, %p3594_p9 }
  0xc8   : > { %p3597_p12 = pnand %p3596_p3, %p3590_p11 }
  0xca   : > { %3600 = shalt.err (!%p3597_p12)
}
  0xcb   : > { %s3601_s26 = scalar_lea.vmem %s4040_s17, 1024  ;;  %s3728_s27 = smov [#allocation9]  }
  0xcc   : > { %p3602_p13 = scmp.ne.s32.totalorder %s4040_s17, %s3601_s26  ;;  %s3606_s9 = sshll.u32 %s3728_s27, 4  ;;  %s3607_s9 = int_to_ptr.vmem [resolvable:$false] %s3606_s9 }
  0xcd   : > { %s3608_s2 = scalar_lea.vmem %s3607_s9, 2048  ;;  %p3609_p5 = scmp.lt.s32.totalorder %s4040_s17, %s3607_s9 }
  0xce   : > { %p3604_p0 = pnand %p3602_p13, %p3558_p1  ;;  %p3610_p2 = scmp.lt.s32.totalorder %s3608_s2, %s3601_s26 }
  0xd0   : > { %p3605_p7 = pneg %p3604_p0  ;;  %p3611_p4 = por %p3610_p2, %p3609_p5 }
  0xd2   : > { %p3612_p9 = pnand %p3611_p4, %p3605_p7 }
  0xd4   : > { %3615 = shalt.err (!%p3612_p9)
}
  0xd5   : > { %s4936_s4 = smov 4   ;;  %s4937_s24 = smov 64  }
  0xd6   : > { %3093 = dma.hbm_to_vmem [thread:$0]  (!%p4005_p10), %s4047_s3, 1024, %s4040_s17, %s4049_s0, %s4937_s24, %s4937_s24, %s4936_s4  }
  0xd7   : > { %p4938_p1 = scmp.ne.s32.totalorder %s4920_s16, 0 }
  0xd9   : > { %447 = sbr.rel (%p4938_p1) target bundleno = 2067 (0x813), region = 56 }
  0xe0   : > { %s4081_s5 = sand.u32 1, %s3698_s10  }
  0xe1   : > { %s2768_s12 = sshll.u32 %s4081_s5, 2  ;;  %s450_s19 = scalar_lea.sflag [#allocation7], %s4081_s5 }
  0xe2   : > { %s4085_s20 = scalar_lea.vmem [#allocation6], %s2768_s12 }
  0xe3   : > { %3669 = dma.done.wait (%p3972_p6), %s450_s19, 64  }
  0xe4   : > { %3671 = vsyncadd (%p3972_p6), %s450_s19, 4294967232  ;;  %s458_s0 = sand.u32 1, %s3816_s15   ;;  %s2769_s16 = sshll.u32 %s4081_s5, 6 }
  0xe5   : > { %s459_s25 = scalar_lea.sflag [#allocation10], %s458_s0  ;;  %s4093_s17 = scalar_lea.vmem [#allocation9], %s2769_s16 }
  0xe6   : > { %3673 = dma.done.wait (%p3972_p6), %s459_s25, 1024  }
  0xe7   : > { %3675 = vsyncadd (%p3972_p6), %s459_s25, 4294966272  ;;  %p4939_p10 = scmp.eq.s32.totalorder %s3816_s15, 0 }
  0xe9   : > { %3677 = dma.done.wait (%p4939_p10), [#allocation10], 4096   ;;  %p4940_p11 = pmov %p4939_p10 }
  0xea   : > { %p4941_p8 = pmov %p4939_p10 }
  0xeb   : > { %3679 = vsyncadd (%p4940_p11), [#allocation10], 4294963200 }
  0xec   : > { %3681 = dma.done.wait (%p4941_p8), [#allocation13], 8192   ;;  %p4942_p3 = pmov %p4941_p8 }
  0xee   : > { %3683 = vsyncadd (%p4942_p3), [#allocation13], 4294959104  ;;  %p4943_p12 = pmov %p4942_p3 }
  0xef   : > { %p4944_p13 = pmov %p4942_p3 }
  0xf0   : > { %3685 = dma.done.wait (%p4943_p12), [#allocation16], 4096  }
  0xf1   : > { %3687 = vsyncadd (%p4944_p13), [#allocation16], 4294963200  ;;  %v4897_v0 = vmov 0   ;;  %v3176_v1 = vld [vmem:[#allocation11 + $0x4] ss:$16 sps:$4 sm:$0xff]   ;;  %v3249_v51 = vld [vmem:[%s4093_s17 + $0x8] sm:$0xff]  }
  0xf2   : > { %771 = vmatprep.mubr.bf16.mxu0 %v4897_v0  ;;  %812 = vmatprep.mubr.bf16.mxu1 %v4897_v0  ;;  %v3178_v2 = vld [vmem:[#allocation11 + $0xc] ss:$16 sps:$4 sm:$0xff]   ;;  %v3180_v3 = vld [vmem:[#allocation11] ss:$16 sps:$4 sm:$0xff]   ;;  %v3181_v4 = vld [vmem:[#allocation11 + $0x8] ss:$16 sps:$4 sm:$0xff]  }
  0xf3   : > { %3174 = vset.pattern.permute.xlu0 %v4897_v0  ;;  %3175 = vset.pattern.permute.xlu1 %v4897_v0  ;;  %v3182_v5 = vld [vmem:[#allocation11 + $0x24] ss:$16 sps:$4 sm:$0xff]   ;;  %v3184_v6 = vld [vmem:[#allocation11 + $0x2c] ss:$16 sps:$4 sm:$0xff]   ;;  %v3186_v7 = vld [vmem:[#allocation11 + $0x20] ss:$16 sps:$4 sm:$0xff]  }
  0xf4   : > { %739 = vmatprep.subr.bf16.mxu0 %v3176_v1  ;;  %780 = vmatprep.subr.bf16.mxu1 %v3178_v2  ;;  %v3187_v8 = vld [vmem:[#allocation11 + $0x28] ss:$16 sps:$4 sm:$0xff]   ;;  %v3188_v9 = vld [vmem:[#allocation11 + $0x44] ss:$16 sps:$4 sm:$0xff]   ;;  %v3190_v10 = vld [vmem:[#allocation11 + $0x4c] ss:$16 sps:$4 sm:$0xff]  }
  0xf5   : > { %740 = vmatpush1.bf16.msra.mxu0 %v3180_v3  ;;  %781 = vmatpush1.bf16.msra.mxu1 %v3181_v4  ;;  %v3192_v11 = vld [vmem:[#allocation11 + $0x40] ss:$16 sps:$4 sm:$0xff]   ;;  %v3193_v12 = vld [vmem:[#allocation11 + $0x48] ss:$16 sps:$4 sm:$0xff]   ;;  %v3194_v13 = vld [vmem:[#allocation11 + $0x64] ss:$16 sps:$4 sm:$0xff]  }
  0xf6   : > { %741 = vmatprep.subr.bf16.mxu0 %v3182_v5  ;;  %782 = vmatprep.subr.bf16.mxu1 %v3184_v6  ;;  %v3196_v14 = vld [vmem:[#allocation11 + $0x6c] ss:$16 sps:$4 sm:$0xff]   ;;  %v3198_v15 = vld [vmem:[#allocation11 + $0x60] ss:$16 sps:$4 sm:$0xff]   ;;  %v3199_v16 = vld [vmem:[#allocation11 + $0x68] ss:$16 sps:$4 sm:$0xff]  }
  0xf7   : > { %v3200_v17 = vld [vmem:[#allocation11 + $0x84] ss:$16 sps:$4 sm:$0xff]   ;;  %v3202_v18 = vld [vmem:[#allocation11 + $0x8c] ss:$16 sps:$4 sm:$0xff]   ;;  %v3204_v19 = vld [vmem:[#allocation11 + $0x80] ss:$16 sps:$4 sm:$0xff]  }
  0xf8   : > { %v3205_v20 = vld [vmem:[#allocation11 + $0x88] ss:$16 sps:$4 sm:$0xff]   ;;  %v3206_v21 = vld [vmem:[#allocation11 + $0xa4] ss:$16 sps:$4 sm:$0xff]   ;;  %v3208_v22 = vld [vmem:[#allocation11 + $0xac] ss:$16 sps:$4 sm:$0xff]  }
  0xf9   : > { %742 = vmatpush1.bf16.msra.mxu0 %v3186_v7  ;;  %783 = vmatpush1.bf16.msra.mxu1 %v3187_v8  ;;  %v3210_v23 = vld [vmem:[#allocation11 + $0xa0] ss:$16 sps:$4 sm:$0xff]   ;;  %v3211_v24 = vld [vmem:[#allocation11 + $0xa8] ss:$16 sps:$4 sm:$0xff]   ;;  %v3212_v25 = vld [vmem:[#allocation11 + $0xc4] ss:$16 sps:$4 sm:$0xff]  }
  0xfa   : > { %743 = vmatprep.subr.bf16.mxu0 %v3188_v9  ;;  %784 = vmatprep.subr.bf16.mxu1 %v3190_v10  ;;  %v3214_v26 = vld [vmem:[#allocation11 + $0xcc] ss:$16 sps:$4 sm:$0xff]   ;;  %v3216_v27 = vld [vmem:[#allocation11 + $0xc0] ss:$16 sps:$4 sm:$0xff]   ;;  %v3217_v28 = vld [vmem:[#allocation11 + $0xc8] ss:$16 sps:$4 sm:$0xff]  }
  0xfb   : > { %v3218_v29 = vld [vmem:[#allocation11 + $0xe4] ss:$16 sps:$4 sm:$0xff]   ;;  %v3220_v30 = vld [vmem:[#allocation11 + $0xec] ss:$16 sps:$4 sm:$0xff]   ;;  %v3222_v31 = vld [vmem:[#allocation11 + $0xe0] ss:$16 sps:$4 sm:$0xff]  }
  0xfc   : > { %v3223_v32 = vld [vmem:[#allocation11 + $0xe8] ss:$16 sps:$4 sm:$0xff]   ;;  %v3226_v33 = vld [vmem:[#allocation12 + $0x4] ss:$16 sps:$4 sm:$0xff]   ;;  %v3224_v35 = vld [vmem:[#allocation12] ss:$16 sps:$4 sm:$0xff]  }
  0xfd   : > { %744 = vmatpush1.bf16.msra.mxu0 %v3192_v11  ;;  %785 = vmatpush1.bf16.msra.mxu1 %v3193_v12  ;;  %v546_v34 = vld [vmem:[%s4085_s20] sm:$0xf]  ;;  %v3229_v36 = vld [vmem:[#allocation12 + $0x24] ss:$16 sps:$4 sm:$0xff]   ;;  %v3227_v37 = vld [vmem:[#allocation12 + $0x20] ss:$16 sps:$4 sm:$0xff]  }
  0xfe   : > { %745 = vmatprep.subr.bf16.mxu0 %v3194_v13  ;;  %786 = vmatprep.subr.bf16.mxu1 %v3196_v14  ;;  %v3232_v38 = vld [vmem:[#allocation12 + $0x44] ss:$16 sps:$4 sm:$0xff]   ;;  %v3230_v39 = vld [vmem:[#allocation12 + $0x40] ss:$16 sps:$4 sm:$0xff]   ;;  %v3251_v53 = vld [vmem:[%s4093_s17 + $0x18] sm:$0xff]   ;;  %s3730_s15 = smov 64  }
  0xff   : > { %v3235_v40 = vld [vmem:[#allocation12 + $0x64] ss:$16 sps:$4 sm:$0xff]   ;;  %v3233_v41 = vld [vmem:[#allocation12 + $0x60] ss:$16 sps:$4 sm:$0xff]   ;;  %v3253_v55 = vld [vmem:[%s4093_s17 + $0x28] sm:$0xff]   ;;  %vm3732_vm0 = vmmov 0  }
 0x100   : > { %v3238_v42 = vld [vmem:[#allocation12 + $0x84] ss:$16 sps:$4 sm:$0xff]   ;;  %v3236_v43 = vld [vmem:[#allocation12 + $0x80] ss:$16 sps:$4 sm:$0xff]   ;;  %v3255_v57 = vld [vmem:[%s4093_s17 + $0x38] sm:$0xff]   ;;  %s4950_s27 = sld [smem:[#allocation42_spill]] }
 0x101   : > { %746 = vmatpush1.bf16.msra.mxu0 %v3198_v15  ;;  %787 = vmatpush1.bf16.msra.mxu1 %v3199_v16  ;;  %v3241_v44 = vld [vmem:[#allocation12 + $0xa4] ss:$16 sps:$4 sm:$0xff]   ;;  %v3239_v45 = vld [vmem:[#allocation12 + $0xa0] ss:$16 sps:$4 sm:$0xff]   ;;  %vm886_vm1 = vcmask 7168   ;;  %s4972_s9 = sld [smem:[#allocation25_spill]] }
 0x102   : > { %747 = vmatprep.subr.bf16.mxu0 %v3200_v17  ;;  %788 = vmatprep.subr.bf16.mxu1 %v3202_v18  ;;  %v3244_v46 = vld [vmem:[#allocation12 + $0xc4] ss:$16 sps:$4 sm:$0xff]   ;;  %v3242_v47 = vld [vmem:[#allocation12 + $0xc0] ss:$16 sps:$4 sm:$0xff]   ;;  %s2775_s2 = sshll.u32 %s4081_s5, 3  ;;  %s4973_s0 = sld [smem:[#allocation43_spill]] }
 0x103   : > { %v3247_v48 = vld [vmem:[#allocation12 + $0xe4] ss:$16 sps:$4 sm:$0xff]   ;;  %v3245_v49 = vld [vmem:[#allocation12 + $0xe0] ss:$16 sps:$4 sm:$0xff]   ;;  %s529_s24 = scalar_lea.vmem [#allocation18], %s2775_s2  ;;  %s2547_s25 = scalar_lea.sflag [#allocation8], %s4081_s5 }
 0x104   : > { %v3248_v50 = vld [vmem:[%s4093_s17] sm:$0xff]   ;;  %v3250_v52 = vld [vmem:[%s4093_s17 + $0x10] sm:$0xff]   ;;  %s2561_s12 = sshll.u32 %s529_s24, 4  ;;  %p4974_p0 = scmp.ne.s32.totalorder %s4931_s22, 0  ;;  %s4832_s12 = int_to_ptr.vmem [resolvable:$true] %s2561_s12 }
 0x105   : > { %748 = vmatpush1.bf16.msra.mxu0 %v3204_v19  ;;  %789 = vmatpush1.bf16.msra.mxu1 %v3205_v20  ;;  %v3252_v54 = vld [vmem:[%s4093_s17 + $0x20] sm:$0xff]   ;;  %v3254_v56 = vld [vmem:[%s4093_s17 + $0x30] sm:$0xff]  }
 0x106   : > { %749 = vmatprep.subr.bf16.mxu0 %v3206_v21  ;;  %790 = vmatprep.subr.bf16.mxu1 %v3208_v22 }
 0x107   : > { %s2881_s4 = sshll.u32 %s4972_s9, 7 }
 0x108   : > { %s4830_s16 = scalar_lea.hbm %s4973_s0, %s2881_s4 }
 0x109   : > { %750 = vmatpush1.bf16.msra.mxu0 %v3210_v23  ;;  %791 = vmatpush1.bf16.msra.mxu1 %v3211_v24 }
 0x10a   : > { %751 = vmatprep.subr.bf16.mxu0 %v3212_v25  ;;  %792 = vmatprep.subr.bf16.mxu1 %v3214_v26 }
 0x10d   : > { %752 = vmatpush1.bf16.msra.mxu0 %v3216_v27  ;;  %793 = vmatpush1.bf16.msra.mxu1 %v3217_v28 }
 0x10e   : > { %753 = vmatprep.subr.bf16.mxu0 %v3218_v29  ;;  %794 = vmatprep.subr.bf16.mxu1 %v3220_v30 }
 0x111   : > { %754 = vmatpush1.bf16.msra.mxu0 %v3222_v31  ;;  %795 = vmatpush1.bf16.msra.mxu1 %v3223_v32 }
 0x112   : > { %1155 = vmatprep.subr.bf16.mxu0 %v3226_v33 }
 0x114   : > { %772 = vmatmul.mubr.bf16.vlgmr.msra.gmra.mrb[0].mxu0 %v546_v34  ;;  %813 = vmatmul.mubr.bf16.vlgmr.msra.gmra.mrb[0].mxu1 %v546_v34 }
 0x115   : > { %1156 = vmatpush1.bf16.msra.mxu0 %v3224_v35  ;;  %1187 = vmatprep.mubr.bf16.mxu0 %v4897_v0 }
 0x116   : > { %1157 = vmatprep.subr.bf16.mxu0 %v3229_v36  ;;  %1300 = vmatprep.mubr.bf16.mxu1 %v4897_v0 }
 0x119   : > { %1158 = vmatpush1.bf16.msra.mxu0 %v3227_v37 }
 0x11a   : > { %1159 = vmatprep.subr.bf16.mxu0 %v3232_v38 }
 0x11d   : > { %1160 = vmatpush1.bf16.msra.mxu0 %v3230_v39 }
 0x11e   : > { %1161 = vmatprep.subr.bf16.mxu0 %v3235_v40 }
 0x121   : > { %1162 = vmatpush1.bf16.msra.mxu0 %v3233_v41 }
 0x122   : > { %1163 = vmatprep.subr.bf16.mxu0 %v3238_v42 }
 0x125   : > { %1164 = vmatpush1.bf16.msra.mxu0 %v3236_v43 }
 0x126   : > { %1165 = vmatprep.subr.bf16.mxu0 %v3241_v44 }
 0x129   : > { %1166 = vmatpush1.bf16.msra.mxu0 %v3239_v45 }
 0x12a   : > { %1167 = vmatprep.subr.bf16.mxu0 %v3244_v46 }
 0x12d   : > { %1168 = vmatpush1.bf16.msra.mxu0 %v3242_v47 }
 0x12e   : > { %1169 = vmatprep.subr.bf16.mxu0 %v3247_v48 }
 0x131   : > { %1170 = vmatpush1.bf16.msra.mxu0 %v3245_v49 }
 0x134   : > { %1188 = vmatmul.mubr.bf16.vlgmr.msra.gmra.mrb[4].mxu0 %v3248_v50 }
 0x135   : > { %1197 = vmatprep.mubr.bf16.mxu0 %v4897_v0 }
 0x13c   : > { %1198 = vmatmul.mubr.bf16.gmra.mrb[8].mxu0 %v3249_v51 }
 0x13d   : > { %1207 = vmatprep.mubr.bf16.mxu0 %v4897_v0 }
 0x144   : > { %1208 = vmatmul.mubr.bf16.gmra.mrb[12].mxu0 %v3250_v52 }
 0x145   : > { %1217 = vmatprep.mubr.bf16.mxu0 %v4897_v0 }
 0x14c   : > { %1218 = vmatmul.mubr.bf16.gmra.mrb[16].mxu0 %v3251_v53 }
 0x14d   : > { %1227 = vmatprep.mubr.bf16.mxu0 %v4897_v0 }
 0x154   : > { %1228 = vmatmul.mubr.bf16.gmra.mrb[20].mxu0 %v3252_v54 }
 0x155   : > { %1237 = vmatprep.mubr.bf16.mxu0 %v4897_v0 }
 0x15c   : > { %1238 = vmatmul.mubr.bf16.gmra.mrb[24].mxu0 %v3253_v55 }
 0x15d   : > { %1247 = vmatprep.mubr.bf16.mxu0 %v4897_v0 }
 0x164   : > { %1248 = vmatmul.mubr.bf16.gmra.mrb[28].mxu0 %v3254_v56 }
 0x165   : > { %1257 = vmatprep.mubr.bf16.mxu0 %v4897_v0 }
 0x16c   : > { %1258 = vmatmul.mubr.bf16.gmra.mrb[32].mxu0 %v3255_v57 }
 0x1e7   : > { %v4133_v58 = vpop.f32.mrb[0].mxu0  ;;  %v4135_v59 = vpop.f32.mrb[0].mxu1 }
 0x1e8   : > { %v4137_v60 = vpop.f32.mrb[1].mxu0  ;;  %v855_v61 = vmul.f32 %v4135_v59, %v4135_v59  ;;  %v823_v62 = vmul.f32 %v4133_v58, %v4133_v58  ;;  %v4143_v63 = vpop.f32.mrb[1].mxu1 }
 0x1e9   : > { %v777_v1 = vpop.f32.mrb[2].mxu0  ;;  %v818_v2 = vpop.f32.mrb[2].mxu1  ;;  %v869_v4 = vmul.f32 %v4143_v63, %v4143_v63  ;;  %v838_v6 = vmul.f32 %v4137_v60, %v4137_v60 }
 0x1ea   : > { %856 = vadd.xlane.f32.xlu0 %v855_v61  ;;  %824 = vadd.xlane.f32.xlu1 %v823_v62  ;;  %v778_v3 = vpop.f32.mrb[3].mxu0  ;;  %v819_v5 = vpop.f32.mrb[3].mxu1 }
 0x1ee   : > { %870 = vadd.xlane.f32.xlu1 %v869_v4  ;;  %839 = vadd.xlane.f32.xlu0 %v838_v6 }
 0x207   : > { %v4149_v7 = vpop.f32.mrb[4].mxu0 }
 0x208   : > { %v4151_v8 = vpop.f32.mrb[5].mxu0  ;;  %v1456_v9 = vmul.f32 %v4149_v7, %v4149_v7 }
 0x209   : > { %v4155_v10 = vpop.f32.mrb[6].mxu0  ;;  %v1812_v13 = vmul.f32 %v4151_v8, %v4151_v8 }
 0x20a   : > { %1472 = vadd.xlane.f32.xlu0 %v1456_v9  ;;  %v4157_v11 = vpop.f32.mrb[7].mxu0  ;;  %v1457_v16 = vmul.f32 %v4155_v10, %v4155_v10 }
 0x20b   : > { %v1813_v12 = vmul.f32 %v4157_v11, %v4157_v11 }
 0x20d   : > { %1830 = vadd.xlane.f32.xlu1 %v1813_v12 }
 0x20e   : > { %1828 = vadd.xlane.f32.xlu0 %v1812_v13 }
 0x20f   : > { %v4163_v14 = vpop.f32.mrb[8].mxu0 }
 0x210   : > { %v4165_v15 = vpop.f32.mrb[9].mxu0  ;;  %v1458_v17 = vmul.f32 %v4163_v14, %v4163_v14 }
 0x211   : > { %v4171_v18 = vpop.f32.mrb[10].mxu0  ;;  %v1814_v20 = vmul.f32 %v4165_v15, %v4165_v15 }
 0x212   : > { %1474 = vadd.xlane.f32.xlu0 %v1457_v16  ;;  %1476 = vadd.xlane.f32.xlu1 %v1458_v17  ;;  %v4173_v19 = vpop.f32.mrb[11].mxu0  ;;  %v1459_v21 = vmul.f32 %v4171_v18, %v4171_v18 }
 0x213   : > { %v1815_v24 = vmul.f32 %v4173_v19, %v4173_v19 }
 0x216   : > { %1832 = vadd.xlane.f32.xlu0 %v1814_v20  ;;  %1478 = vadd.xlane.f32.xlu1 %v1459_v21 }
 0x217   : > { %v4179_v22 = vpop.f32.mrb[12].mxu0 }
 0x218   : > { %v4181_v23 = vpop.f32.mrb[13].mxu0  ;;  %v1460_v25 = vmul.f32 %v4179_v22, %v4179_v22 }
 0x219   : > { %v4187_v26 = vpop.f32.mrb[14].mxu0  ;;  %v1816_v28 = vmul.f32 %v4181_v23, %v4181_v23 }
 0x21a   : > { %1834 = vadd.xlane.f32.xlu1 %v1815_v24  ;;  %1480 = vadd.xlane.f32.xlu0 %v1460_v25  ;;  %v4189_v27 = vpop.f32.mrb[15].mxu0  ;;  %v1461_v29 = vmul.f32 %v4187_v26, %v4187_v26 }
 0x21b   : > { %v1817_v32 = vmul.f32 %v4189_v27, %v4189_v27 }
 0x21e   : > { %1836 = vadd.xlane.f32.xlu0 %v1816_v28  ;;  %1482 = vadd.xlane.f32.xlu1 %v1461_v29 }
 0x21f   : > { %v4195_v30 = vpop.f32.mrb[16].mxu0 }
 0x220   : > { %v4197_v31 = vpop.f32.mrb[17].mxu0  ;;  %v1462_v33 = vmul.f32 %v4195_v30, %v4195_v30 }
 0x221   : > { %v4203_v34 = vpop.f32.mrb[18].mxu0  ;;  %v1818_v36 = vmul.f32 %v4197_v31, %v4197_v31 }
 0x222   : > { %1838 = vadd.xlane.f32.xlu1 %v1817_v32  ;;  %1484 = vadd.xlane.f32.xlu0 %v1462_v33  ;;  %v4205_v35 = vpop.f32.mrb[19].mxu0  ;;  %v1463_v37 = vmul.f32 %v4203_v34, %v4203_v34 }
 0x223   : > { %v1819_v40 = vmul.f32 %v4205_v35, %v4205_v35 }
 0x226   : > { %1840 = vadd.xlane.f32.xlu0 %v1818_v36  ;;  %1486 = vadd.xlane.f32.xlu1 %v1463_v37 }
 0x227   : > { %v4211_v38 = vpop.f32.mrb[20].mxu0 }
 0x228   : > { %v4213_v39 = vpop.f32.mrb[21].mxu0  ;;  %v1464_v41 = vmul.f32 %v4211_v38, %v4211_v38 }
 0x229   : > { %v4219_v42 = vpop.f32.mrb[22].mxu0  ;;  %v1820_v44 = vmul.f32 %v4213_v39, %v4213_v39 }
 0x22a   : > { %1842 = vadd.xlane.f32.xlu1 %v1819_v40  ;;  %1488 = vadd.xlane.f32.xlu0 %v1464_v41  ;;  %v4221_v43 = vpop.f32.mrb[23].mxu0  ;;  %v1465_v46 = vmul.f32 %v4219_v42, %v4219_v42 }
 0x22b   : > { %v1821_v45 = vmul.f32 %v4221_v43, %v4221_v43 }
 0x22e   : > { %1844 = vadd.xlane.f32.xlu1 %v1820_v44  ;;  %1846 = vadd.xlane.f32.xlu0 %v1821_v45 }
 0x22f   : > { %v4229_v47 = vpop.f32.mrb[24].mxu0 }
 0x230   : > { %v4231_v48 = vpop.f32.mrb[25].mxu0  ;;  %v1466_v49 = vmul.f32 %v4229_v47, %v4229_v47 }
 0x231   : > { %v4235_v50 = vpop.f32.mrb[26].mxu0  ;;  %v1822_v52 = vmul.f32 %v4231_v48, %v4231_v48 }
 0x232   : > { %1490 = vadd.xlane.f32.xlu1 %v1465_v46  ;;  %1492 = vadd.xlane.f32.xlu0 %v1466_v49  ;;  %v4237_v51 = vpop.f32.mrb[27].mxu0  ;;  %v1467_v54 = vmul.f32 %v4235_v50, %v4235_v50 }
 0x233   : > { %v1823_v53 = vmul.f32 %v4237_v51, %v4237_v51 }
 0x236   : > { %1848 = vadd.xlane.f32.xlu1 %v1822_v52  ;;  %1850 = vadd.xlane.f32.xlu0 %v1823_v53 }
 0x237   : > { %v4245_v55 = vpop.f32.mrb[28].mxu0 }
 0x238   : > { %v4247_v56 = vpop.f32.mrb[29].mxu0  ;;  %v1468_v57 = vmul.f32 %v4245_v55, %v4245_v55 }
 0x239   : > { %v4251_v61 = vpop.f32.mrb[30].mxu0  ;;  %v1824_v1 = vmul.f32 %v4247_v56, %v4247_v56 }
 0x23a   : > { %1494 = vadd.xlane.f32.xlu1 %v1467_v54  ;;  %1496 = vadd.xlane.f32.xlu0 %v1468_v57  ;;  %v4253_v62 = vpop.f32.mrb[31].mxu0  ;;  %v1469_v3 = vmul.f32 %v4251_v61, %v4251_v61 }
 0x23b   : > { %v1825_v2 = vmul.f32 %v4253_v62, %v4253_v62 }
 0x23e   : > { %1852 = vadd.xlane.f32.xlu1 %v1824_v1  ;;  %1854 = vadd.xlane.f32.xlu0 %v1825_v2 }
 0x23f   : > { %v4261_v4 = vpop.f32.mrb[32].mxu0 }
 0x240   : > { %v1470_v5 = vmul.f32 %v4261_v4, %v4261_v4  ;;  %v4265_v6 = vpop.f32.mrb[33].mxu0 }
 0x241   : > { %v4267_v9 = vpop.f32.mrb[34].mxu0 }
 0x242   : > { %1498 = vadd.xlane.f32.xlu1 %v1469_v3  ;;  %1500 = vadd.xlane.f32.xlu0 %v1470_v5  ;;  %v1471_v12 = vmul.f32 %v4267_v9, %v4267_v9  ;;  %v4271_v13 = vpop.f32.mrb[35].mxu0 }
 0x246   : > { %1502 = vadd.xlane.f32.xlu1 %v1471_v12 }
 0x277   : > { %v857_v16 = vpop.xlane.xlu0 %856  ;;  %v825_v17 = vpop.xlane.xlu1 %824 }
 0x278   : > { %v858_v20 = vmul.f32 0.0078125, %v857_v16  ;;  %v827_v21 = vmul.f32 0.0078125, %v825_v17 }
 0x27a   : > { %v859_v24 = vadd.f32 1e-06, %v858_v20  ;;  %v828_v25 = vadd.f32 1e-06, %v827_v21 }
 0x27b   : > { %v871_v28 = vpop.xlane.xlu1 %870  ;;  %v840_v29 = vpop.xlane.xlu0 %839 }
 0x27c   : > { %3312 = vrsqrt.f32 %v859_v24  ;;  %v872_v32 = vmul.f32 0.0078125, %v871_v28  ;;  %v841_v33 = vmul.f32 0.0078125, %v840_v29 }
 0x27d   : > { %3314 = vrsqrt.f32 %v828_v25 }
 0x27e   : > { %v873_v36 = vadd.f32 1e-06, %v872_v32  ;;  %v842_v37 = vadd.f32 1e-06, %v841_v33 }
 0x280   : > { %3316 = vrsqrt.f32 %v873_v36 }
 0x281   : > { %3318 = vrsqrt.f32 %v842_v37 }
 0x286   : > { %v3313_v40 = vpop.eup %3312 }
 0x287   : > { %v3315_v41 = vpop.eup %3314  ;;  %v4274_v44 = vmul.f32 %v3313_v40, %v4135_v59 }
 0x288   : > { %v4277_v45 = vmul.f32 %v3315_v41, %v4133_v58 }
 0x289   : > { %4945 = vst [vmem:[#allocation26_spill] sm:$0xff] %v4274_v44 }
 0x28a   : > { %v3317_v46 = vpop.eup %3316 }
 0x28b   : > { %v3319_v49 = vpop.eup %3318  ;;  %v4280_v52 = vmul.f32 %v3317_v46, %v4143_v63 }
 0x28c   : > { %v4283_v53 = vmul.f32 %v3319_v49, %v4137_v60 }
 0x297   : > { %v1473_v54 = vpop.xlane.xlu0 %1472 }
 0x298   : > { %v1505_v57 = vmul.f32 0.0078125, %v1473_v54 }
 0x29a   : > { %v1521_v1 = vadd.f32 1e-06, %v1505_v57  ;;  %v1831_v2 = vpop.xlane.xlu1 %1830 }
 0x29b   : > { %v1861_v3 = vmul.f32 0.0078125, %v1831_v2  ;;  %v1829_v5 = vpop.xlane.xlu0 %1828 }
 0x29c   : > { %3320 = vrsqrt.f32 %v1521_v1  ;;  %v1860_v59 = vmul.f32 0.0078125, %v1829_v5  ;;  %v4899_v5 = vmov 0.0  }
 0x29d   : > { %v1877_v12 = vadd.f32 1e-06, %v1861_v3  ;;  %2965 = vmatprep.subr.bf16.mxu0 %v4899_v5  ;;  %2981 = vmatprep.mubr.msk.bf16.mxu0 %vm3732_vm0, %v4899_v5 }
 0x29e   : > { %v1876_v16 = vadd.f32 1e-06, %v1860_v59 }
 0x29f   : > { %3322 = vrsqrt.f32 %v1877_v12  ;;  %v1475_v58 = vpop.xlane.xlu0 %1474  ;;  %v1477_v17 = vpop.xlane.xlu1 %1476 }
 0x2a0   : > { %3324 = vrsqrt.f32 %v1876_v16  ;;  %v1506_v20 = vmul.f32 0.0078125, %v1475_v58  ;;  %v1507_v63 = vmul.f32 0.0078125, %v1477_v17 }
 0x2a2   : > { %v1522_v21 = vadd.f32 1e-06, %v1506_v20  ;;  %v1523_v24 = vadd.f32 1e-06, %v1507_v63 }
 0x2a3   : > { %v1833_v60 = vpop.xlane.xlu0 %1832  ;;  %v1479_v25 = vpop.xlane.xlu1 %1478 }
 0x2a4   : > { %3326 = vrsqrt.f32 %v1522_v21  ;;  %v1862_v28 = vmul.f32 0.0078125, %v1833_v60  ;;  %v1508_v29 = vmul.f32 0.0078125, %v1479_v25 }
 0x2a5   : > { %3328 = vrsqrt.f32 %v1523_v24 }
 0x2a6   : > { %v3321_v32 = vpop.eup %3320  ;;  %v1878_v33 = vadd.f32 1e-06, %v1862_v28  ;;  %v1524_v36 = vadd.f32 1e-06, %v1508_v29 }
 0x2a7   : > { %v1835_v37 = vpop.xlane.xlu1 %1834  ;;  %v1481_v40 = vpop.xlane.xlu0 %1480  ;;  %v4286_v41 = vmul.f32 %v3321_v32, %v4149_v7 }
 0x2a8   : > { %3330 = vrsqrt.f32 %v1878_v33  ;;  %v1863_v46 = vmul.f32 0.0078125, %v1835_v37  ;;  %v1509_v49 = vmul.f32 0.0078125, %v1481_v40 }
 0x2a9   : > { %v3323_v54 = vpop.eup %3322  ;;  %3332 = vrsqrt.f32 %v1524_v36  ;;  %1585 = vrot.lane.b32.xlu0 %v4286_v41, %s3730_s15 }
 0x2aa   : > { %v3325_v57 = vpop.eup %3324  ;;  %v1879_v1 = vadd.f32 1e-06, %v1863_v46  ;;  %v1525_v2 = vadd.f32 1e-06, %v1509_v49  ;;  %v4291_v3 = vmul.f32 %v3323_v54, %v4157_v11 }
 0x2ab   : > { %v1837_v7 = vpop.xlane.xlu0 %1836  ;;  %v1483_v59 = vpop.xlane.xlu1 %1482  ;;  %v4295_v12 = vmul.f32 %v3325_v57, %v4151_v8 }
 0x2ac   : > { %3334 = vrsqrt.f32 %v1879_v1  ;;  %v1864_v16 = vmul.f32 0.0078125, %v1837_v7  ;;  %v1510_v58 = vmul.f32 0.0078125, %v1483_v59 }
 0x2ad   : > { %3336 = vrsqrt.f32 %v1525_v2 }
 0x2ae   : > { %v3327_v17 = vpop.eup %3326  ;;  %v1880_v20 = vadd.f32 1e-06, %v1864_v16  ;;  %v1526_v63 = vadd.f32 1e-06, %v1510_v58 }
 0x2af   : > { %v3329_v21 = vpop.eup %3328  ;;  %v1839_v24 = vpop.xlane.xlu1 %1838  ;;  %v4298_v11 = vmul.f32 %v3327_v17, %v4155_v10 }
 0x2b0   : > { %v1485_v60 = vpop.xlane.xlu0 %1484  ;;  %3338 = vrsqrt.f32 %v1880_v20  ;;  %v1865_v25 = vmul.f32 0.0078125, %v1839_v24  ;;  %v4301_v29 = vmul.f32 %v3329_v21, %v4163_v14 }
 0x2b1   : > { %v1511_v28 = vmul.f32 0.0078125, %v1485_v60  ;;  %3340 = vrsqrt.f32 %v1526_v63  ;;  %1587 = vrot.lane.b32.xlu1 %v4298_v11, %s3730_s15 }
 0x2b2   : > { %v3331_v8 = vpop.eup %3330  ;;  %v1881_v32 = vadd.f32 1e-06, %v1865_v25  ;;  %1589 = vrot.lane.b32.xlu0 %v4301_v29, %s3730_s15 }
 0x2b3   : > { %v1527_v33 = vadd.f32 1e-06, %v1511_v28  ;;  %v3333_v36 = vpop.eup %3332  ;;  %v1487_v37 = vpop.xlane.xlu1 %1486  ;;  %v4308_v10 = vmul.f32 %v3331_v8, %v4165_v15  ;;  %v1826_v28 = vmul.f32 %v4265_v6, %v4265_v6 }
 0x2b4   : > { %3342 = vrsqrt.f32 %v1881_v32  ;;  %v1512_v40 = vmul.f32 0.0078125, %v1487_v37  ;;  %v4311_v14 = vmul.f32 %v3333_v36, %v4171_v18  ;;  %v1841_v16 = vpop.xlane.xlu0 %1840 }
 0x2b5   : > { %3344 = vrsqrt.f32 %v1527_v33 }
 0x2b6   : > { %v3335_v46 = vpop.eup %3334  ;;  %v1528_v49 = vadd.f32 1e-06, %v1512_v40  ;;  %1591 = vrot.lane.b32.xlu1 %v4311_v14, %s3730_s15 }
 0x2b7   : > { %v3337_v54 = vpop.eup %3336  ;;  %v4316_v57 = vmul.f32 %v3335_v46, %v4173_v19  ;;  %v4344_v20 = vpop.xlane.xlu1 %1842 }
 0x2b8   : > { %v4319_v1 = vmul.f32 %v3337_v54, %v4179_v22  ;;  %3346 = vrsqrt.f32 %v1528_v49 }
 0x2ba   : > { %v3339_v15 = vpop.eup %3338  ;;  %1593 = vrot.lane.b32.xlu0 %v4319_v1, %s3730_s15 }
 0x2bb   : > { %v3341_v18 = vpop.eup %3340  ;;  %v4324_v2 = vmul.f32 %v3339_v15, %v4181_v23  ;;  %v1827_v15 = vmul.f32 %v4271_v13, %v4271_v13 }
 0x2bc   : > { %v4327_v7 = vmul.f32 %v3341_v18, %v4187_v26  ;;  %v1489_v26 = vpop.xlane.xlu0 %1488 }
 0x2be   : > { %v3343_v59 = vpop.eup %3342  ;;  %1595 = vrot.lane.b32.xlu1 %v4327_v7, %s3730_s15 }
 0x2bf   : > { %v3345_v19 = vpop.eup %3344  ;;  %v4332_v22 = vmul.f32 %v3343_v59, %v4189_v27  ;;  %v1845_v27 = vpop.xlane.xlu1 %1844 }
 0x2c0   : > { %v4335_v58 = vmul.f32 %v3345_v19, %v4195_v30  ;;  %v4346_v63 = vpop.xlane.xlu0 %1846 }
 0x2c2   : > { %1597 = vrot.lane.b32.xlu0 %v4335_v58, %s3730_s15  ;;  %v3347_v23 = vpop.eup %3346 }
 0x2c3   : > { %v4340_v17 = vmul.f32 %v3347_v23, %v4203_v34  ;;  %v1491_v24 = vpop.xlane.xlu1 %1490  ;;  %v1513_v34 = vmul.f32 0.0078125, %v1489_v26 }
 0x2c4   : > { %v1493_v21 = vpop.xlane.xlu0 %1492  ;;  %v1514_v32 = vmul.f32 0.0078125, %v1491_v24 }
 0x2c5   : > { %1599 = vrot.lane.b32.xlu1 %v4340_v17, %s3730_s15  ;;  %v1529_v36 = vadd.f32 1e-06, %v1513_v34  ;;  %v1515_v49 = vmul.f32 0.0078125, %v1493_v21 }
 0x2c6   : > { %v1530_v40 = vadd.f32 1e-06, %v1514_v32 }
 0x2c7   : > { %v1849_v60 = vpop.xlane.xlu1 %1848  ;;  %3348 = vrsqrt.f32 %v1529_v36  ;;  %v1531_v19 = vadd.f32 1e-06, %v1515_v49 }
 0x2c8   : > { %v4348_v30 = vpop.xlane.xlu0 %1850  ;;  %3350 = vrsqrt.f32 %v1530_v40 }
 0x2cb   : > { %v1495_v8 = vpop.xlane.xlu1 %1494 }
 0x2cc   : > { %v1497_v25 = vpop.xlane.xlu0 %1496  ;;  %v1516_v59 = vmul.f32 0.0078125, %v1495_v8 }
 0x2cd   : > { %v1517_v37 = vmul.f32 0.0078125, %v1497_v25 }
 0x2ce   : > { %v1532_v24 = vadd.f32 1e-06, %v1516_v59 }
 0x2cf   : > { %v1853_v46 = vpop.xlane.xlu1 %1852  ;;  %v1533_v54 = vadd.f32 1e-06, %v1517_v37 }
 0x2d0   : > { %v4352_v33 = vpop.xlane.xlu0 %1854 }
 0x2d1   : > { %3352 = vrsqrt.f32 %v1533_v54  ;;  %v3349_v34 = vpop.eup %3348 }
 0x2d2   : > { %3354 = vrsqrt.f32 %v1531_v19  ;;  %v3351_v21 = vpop.eup %3350  ;;  %v4357_v37 = vmul.f32 %v3349_v34, %v4211_v38  ;;  %v1866_v38 = vmul.f32 0.0078125, %v1841_v16 }
 0x2d3   : > { %v1499_v26 = vpop.xlane.xlu1 %1498  ;;  %3356 = vrsqrt.f32 %v1532_v24  ;;  %v4365_v49 = vmul.f32 %v3351_v21, %v4219_v42 }
 0x2d4   : > { %v1501_v18 = vpop.xlane.xlu0 %1500  ;;  %v1882_v42 = vadd.f32 1e-06, %v1866_v38 }
 0x2d5   : > { %v1519_v23 = vmul.f32 0.0078125, %v1501_v18 }
 0x2d7   : > { %v1535_v25 = vadd.f32 1e-06, %v1519_v23  ;;  %v1503_v36 = vpop.xlane.xlu1 %1502 }
 0x2d8   : > { %v1520_v8 = vmul.f32 0.0078125, %v1503_v36  ;;  %v1871_v36 = vmul.f32 0.0078125, %v4348_v30 }
 0x2d9   : > { %3358 = vrsqrt.f32 %v1535_v25 }
 0x2da   : > { %v1536_v18 = vadd.f32 1e-06, %v1520_v8  ;;  %v1873_v8 = vmul.f32 0.0078125, %v4352_v33 }
 0x2e1   : > { %1856 = vadd.xlane.f32.xlu0 %v1826_v28  ;;  %v1518_v28 = vmul.f32 0.0078125, %v1499_v26 }
 0x2e3   : > { %v1534_v32 = vadd.f32 1e-06, %v1518_v28  ;;  %v1870_v28 = vmul.f32 0.0078125, %v1849_v60 }
 0x2e5   : > { %3360 = vrsqrt.f32 %v1534_v32 }
 0x2e6   : > { %3362 = vrsqrt.f32 %v1536_v18 }
 0x2e7   : > { %3364 = vrsqrt.f32 %v1882_v42  ;;  %v4437_v42 = vld [vmem:[#allocation17] sm:$0xff] }
 0x2e9   : > { %1858 = vadd.xlane.f32.xlu1 %v1827_v15  ;;  %v3353_v15 = vpop.eup %3352 }
 0x2ea   : > { %v4362_v40 = vmul.f32 %v3353_v15, %v4245_v55  ;;  %v3355_v54 = vpop.eup %3354  ;;  %v1868_v55 = vmul.f32 0.0078125, %v1845_v27  ;;  %v1867_v27 = vmul.f32 0.0078125, %v4344_v20 }
 0x2eb   : > { %v3357_v59 = vpop.eup %3356  ;;  %v4372_v19 = vmul.f32 %v3355_v54, %v4229_v47 }
 0x2ec   : > { %v3359_v23 = vpop.eup %3358  ;;  %v4382_v16 = vmul.f32 %v3357_v59, %v4235_v50  ;;  %v1884_v47 = vadd.f32 1e-06, %v1868_v55  ;;  %v1886_v50 = vadd.f32 1e-06, %v1870_v28  ;;  %v1883_v32 = vadd.f32 1e-06, %v1867_v27 }
 0x2ed   : > { %v4379_v26 = vmul.f32 %v3359_v23, %v4261_v4  ;;  %v1872_v4 = vmul.f32 0.0078125, %v1853_v46  ;;  %v4457_v28 = vld [vmem:[#allocation15 + $0x8] sm:$0xff] }
 0x2ee   : > { %3366 = vrsqrt.f32 %v1884_v47 }
 0x2ef   : > { %v3361_v24 = vpop.eup %3360  ;;  %3368 = vrsqrt.f32 %v1886_v50  ;;  %v1888_v20 = vadd.f32 1e-06, %v1872_v4  ;;  %v4461_v4 = vld [vmem:[#allocation17 + $0x10] sm:$0xff] }
 0x2f0   : > { %v4389_v25 = vmul.f32 %v3361_v24, %v4251_v61  ;;  %v3363_v34 = vpop.eup %3362  ;;  %v1869_v61 = vmul.f32 0.0078125, %v4346_v63  ;;  %3370 = vrsqrt.f32 %v1883_v32 }
 0x2f1   : > { %v4402_v60 = vmul.f32 %v3363_v34, %v4267_v9  ;;  %v3365_v21 = vpop.eup %3364  ;;  %3372 = vrsqrt.f32 %v1888_v20  ;;  %v1887_v9 = vadd.f32 1e-06, %v1871_v36  ;;  %v1570_v34 = vmul.f32 %v4298_v11, %v4457_v28 }
 0x2f2   : > { %v1885_v46 = vadd.f32 1e-06, %v1869_v61  ;;  %v4410_v15 = vmul.f32 %v3365_v21, %v4197_v31  ;;  %v1889_v31 = vadd.f32 1e-06, %v1873_v8 }
 0x2f4   : > { %3374 = vrsqrt.f32 %v1885_v46  ;;  %v4469_v46 = vld [vmem:[#allocation15 + $0x10] sm:$0xff] }
 0x2f5   : > { %3376 = vrsqrt.f32 %v1887_v9  ;;  %v4473_v9 = vld [vmem:[#allocation17 + $0x18] sm:$0xff] }
 0x2f6   : > { %3378 = vrsqrt.f32 %v1889_v31 }
 0x2f7   : > { %1601 = vrot.lane.b32.xlu0 %v4357_v37, %s3730_s15 }
 0x2f8   : > { %v3367_v63 = vpop.eup %3366 }
 0x2f9   : > { %v4418_v54 = vmul.f32 %v3367_v63, %v4213_v39  ;;  %v3369_v38 = vpop.eup %3368  ;;  %v4471_v63 = vld [vmem:[#allocation15 + $0x18] sm:$0xff] }
 0x2fa   : > { %1603 = vrot.lane.b32.xlu1 %v4365_v49, %s3730_s15  ;;  %v3371_v30 = vpop.eup %3370  ;;  %v4425_v18 = vmul.f32 %v3369_v38, %v4231_v48  ;;  %v4445_v48 = vld [vmem:[#allocation15] sm:$0xff]  ;;  %v1572_v38 = vmul.f32 %v4311_v14, %v4471_v63  ;;  %v4493_v14 = vld [vmem:[#allocation15 + $0x28] sm:$0xff] }
 0x2fb   : > { %1609 = vrot.lane.b32.xlu0 %v4362_v40, %s3730_s15  ;;  %v3373_v59 = vpop.eup %3372  ;;  %v4435_v33 = vmul.f32 %v3371_v30, %v4205_v35  ;;  %v4450_v35 = vld [vmem:[#allocation17 + $0x8] sm:$0xff]  ;;  %v1569_v50 = vmul.f32 %v4286_v41, %v4445_v48 }
 0x2fc   : > { %v4432_v39 = vmul.f32 %v3373_v59, %v4247_v56 }
 0x2fe   : > { %1605 = vrot.lane.b32.xlu1 %v4372_v19, %s3730_s15  ;;  %v3375_v23 = vpop.eup %3374 }
 0x2ff   : > { %846 = vrot.lane.b32.xlu0 %v4283_v53, %s3730_s15  ;;  %v4448_v56 = vmul.f32 %v3375_v23, %v4221_v43  ;;  %v3377_v24 = vpop.eup %3376 }
 0x300   : > { %v4467_v61 = vmul.f32 %v3377_v24, %v4237_v51  ;;  %v3379_v20 = vpop.eup %3378  ;;  %v1571_v51 = vmul.f32 %v4301_v29, %v4469_v46 }
 0x301   : > { %4946 = vst [vmem:[#allocation27_spill] sm:$0xff] %v4448_v56  ;;  %v4484_v30 = vmul.f32 %v3379_v20, %v4253_v62 }
 0x302   : > { %1607 = vrot.lane.b32.xlu1 %v4382_v16, %s3730_s15  ;;  %4947 = vst [vmem:[#allocation28_spill] sm:$0xff] %v4467_v61 }
 0x303   : > { %1613 = vrot.lane.b32.xlu0 %v4379_v26, %s3730_s15  ;;  %4948 = vst [vmem:[#allocation29_spill] sm:$0xff] %v4484_v30 }
 0x306   : > { %1611 = vrot.lane.b32.xlu1 %v4389_v25, %s3730_s15 }
 0x307   : > { %1940 = vrot.lane.b32.xlu0 %v4295_v12, %s3730_s15 }
 0x30a   : > { %832 = vrot.lane.b32.xlu1 %v4277_v45, %s3730_s15 }
 0x30b   : > { %1944 = vrot.lane.b32.xlu0 %v4308_v10, %s3730_s15 }
 0x30e   : > { %1615 = vrot.lane.b32.xlu1 %v4402_v60, %s3730_s15 }
 0x30f   : > { %1948 = vrot.lane.b32.xlu0 %v4324_v2, %s3730_s15 }
 0x312   : > { %1942 = vrot.lane.b32.xlu1 %v4291_v3, %s3730_s15 }
 0x313   : > { %1952 = vrot.lane.b32.xlu0 %v4410_v15, %s3730_s15 }
 0x316   : > { %1946 = vrot.lane.b32.xlu1 %v4316_v57, %s3730_s15 }
 0x317   : > { %1956 = vrot.lane.b32.xlu0 %v4418_v54, %s3730_s15 }
 0x31a   : > { %1950 = vrot.lane.b32.xlu1 %v4332_v22, %s3730_s15 }
 0x31b   : > { %1960 = vrot.lane.b32.xlu0 %v4425_v18, %s3730_s15  ;;  %v1586_v55 = vpop.permute.xlu0 %1585 }
 0x31c   : > { %v1617_v47 = vmul.f32 %v1586_v55, %v4437_v42  ;;  %v4489_v55 = vld [vmem:[#allocation17 + $0x20] sm:$0xff] }
 0x31e   : > { %1954 = vrot.lane.b32.xlu1 %v4435_v33, %s3730_s15  ;;  %v1633_v21 = vadd.f32 %v1617_v47, %v1569_v50  ;;  %v4491_v47 = vld [vmem:[#allocation15 + $0x20] sm:$0xff] }
 0x31f   : > { %1964 = vrot.lane.b32.xlu0 %v4432_v39, %s3730_s15 }
 0x322   : > { %1958 = vrot.lane.b32.xlu1 %v4448_v56, %s3730_s15 }
 0x323   : > { %877 = vrot.lane.b32.xlu0 %v4280_v52, %s3730_s15  ;;  %v1588_v27 = vpop.permute.xlu1 %1587 }
 0x324   : > { %v1590_v43 = vpop.permute.xlu0 %1589  ;;  %v1618_v32 = vmul.f32 %v1588_v27, %v4450_v35  ;;  %v4495_v27 = vld [vmem:[#allocation17 + $0x28] sm:$0xff] }
 0x325   : > { %v1619_v41 = vmul.f32 %v1590_v43, %v4461_v4  ;;  %v1573_v43 = vmul.f32 %v4319_v1, %v4491_v47 }
 0x326   : > { %v1634_v36 = vadd.f32 %v1618_v32, %v1570_v34  ;;  %1962 = vrot.lane.b32.xlu1 %v4467_v61, %s3730_s15  ;;  %v1574_v34 = vmul.f32 %v4327_v7, %v4493_v14 }
 0x327   : > { %v1635_v59 = vadd.f32 %v1619_v41, %v1571_v51  ;;  %v4510_v51 = vld [vmem:[#allocation15 + $0x38] sm:$0xff] }
 0x328   : > { %v1649_v11 = vpack.c.bf16 %v1634_v36, %v1633_v21  ;;  %v1592_v8 = vpop.permute.xlu1 %1591  ;;  %v4506_v36 = vld [vmem:[#allocation17 + $0x30] sm:$0xff] }
 0x329   : > { %v1620_v31 = vmul.f32 %v1592_v8, %v4473_v9  ;;  %v4508_v8 = vld [vmem:[#allocation15 + $0x30] sm:$0xff] }
 0x32a   : > { %2966 = vmatpush3.bf16.xpose.msra.mxu0 %v1649_v11  ;;  %1966 = vrot.lane.b32.xlu1 %v4484_v30, %s3730_s15  ;;  %v4552_v30 = vld [vmem:[#allocation17 + $0x50] sm:$0xff] }
 0x32b   : > { %v1636_v23 = vadd.f32 %v1620_v31, %v1572_v38  ;;  %2967 = vmatprep.subr.bf16.mxu0 %v4899_v5  ;;  %v4512_v38 = vld [vmem:[#allocation17 + $0x38] sm:$0xff]  ;;  %v1575_v31 = vmul.f32 %v4335_v58, %v4508_v8 }
 0x32c   : > { %v1594_v24 = vpop.permute.xlu0 %1593 }
 0x32d   : > { %v1650_v29 = vpack.c.bf16 %v1636_v23, %v1635_v59  ;;  %v1621_v62 = vmul.f32 %v1594_v24, %v4489_v55  ;;  %v1576_v59 = vmul.f32 %v4340_v17, %v4510_v51 }
 0x32e   : > { %863 = vrot.lane.b32.xlu1 %v4274_v44, %s3730_s15 }
 0x32f   : > { %v1637_v20 = vadd.f32 %v1621_v62, %v1573_v43 }
 0x330   : > { %v1596_v50 = vpop.permute.xlu1 %1595 }
 0x331   : > { %v1622_v32 = vmul.f32 %v1596_v50, %v4495_v27 }
 0x332   : > { %2968 = vmatpush3.bf16.xpose.msra.mxu0 %v1650_v29 }
 0x333   : > { %v1638_v21 = vadd.f32 %v1622_v32, %v1574_v34  ;;  %2969 = vmatprep.subr.bf16.mxu0 %v4899_v5 }
 0x334   : > { %v1598_v41 = vpop.permute.xlu0 %1597 }
 0x335   : > { %v1651_v11 = vpack.c.bf16 %v1638_v21, %v1637_v20  ;;  %v1623_v1 = vmul.f32 %v1598_v41, %v4506_v36  ;;  %v4522_v20 = vld [vmem:[#allocation17 + $0x40] sm:$0xff]  ;;  %v4527_v41 = vld [vmem:[%s4885_s6] sm:$0xff] }
 0x337   : > { %v1600_v7 = vpop.permute.xlu1 %1599  ;;  %v1639_v24 = vadd.f32 %v1623_v1, %v1575_v31  ;;  %v4531_v1 = vld [vmem:[#allocation17 + $0x48] sm:$0xff] }
 0x338   : > { %v1624_v23 = vmul.f32 %v1600_v7, %v4512_v38  ;;  %4949 = vst [vmem:[#allocation30_spill] sm:$0xff] %v4531_v1 }
 0x33a   : > { %2970 = vmatpush3.bf16.xpose.msra.mxu0 %v1651_v11  ;;  %v1640_v29 = vadd.f32 %v1624_v23, %v1576_v59  ;;  %v4529_v11 = vld [vmem:[#allocation15 + $0x40] sm:$0xff]  ;;  %v4537_v59 = vld [vmem:[%s4950_s27] sm:$0xff] }
 0x33b   : > { %2971 = vmatprep.subr.bf16.mxu0 %v4899_v5 }
 0x33c   : > { %v1652_v62 = vpack.c.bf16 %v1640_v29, %v1639_v24  ;;  %v845_v24 = vmul.f32 %v4283_v53, %v4537_v59 }
 0x342   : > { %2972 = vmatpush3.bf16.xpose.msra.mxu0 %v1652_v62  ;;  %v4542_v62 = vld [vmem:[#allocation15 + $0x48] sm:$0xff] }
 0x343   : > { %2973 = vmatprep.subr.bf16.mxu0 %v4899_v5  ;;  %4951 = vst [vmem:[#allocation31_spill] sm:$0xff] %v4542_v62 }
 0x36e   : > { %v1857_v50 = vpop.xlane.xlu0 %1856 }
 0x36f   : > { %v1874_v43 = vmul.f32 0.0078125, %v1857_v50 }
 0x371   : > { %v1890_v34 = vadd.f32 1e-06, %v1874_v43  ;;  %v1577_v43 = vmul.f32 %v4357_v37, %v4529_v11 }
 0x372   : > { %v1602_v32 = vpop.permute.xlu0 %1601 }
 0x373   : > { %3380 = vrsqrt.f32 %v1890_v34  ;;  %v1625_v7 = vmul.f32 %v1602_v32, %v4522_v20  ;;  %v1578_v34 = vmul.f32 %v4365_v49, %v4542_v62  ;;  %v4556_v49 = vld [vmem:[#allocation15 + $0x50] sm:$0xff] }
 0x375   : > { %v1641_v0 = vadd.f32 %v1625_v7, %v1577_v43  ;;  %v4955_v43 = vmov 0.0  }
 0x376   : > { %v1610_v58 = vpop.permute.xlu0 %1609  ;;  %v1859_v17 = vpop.xlane.xlu1 %1858  ;;  %891 = vst.msk [vmem:[#allocation4] sm:$0xff] %vm886_vm1, %v4955_v43  ;;  %892 = vst.msk [vmem:[#allocation4 + $0x8] sm:$0xff] %vm886_vm1, %v4955_v43 }
 0x377   : > { %v1875_v21 = vmul.f32 0.0078125, %v1859_v17  ;;  %893 = vst.msk [vmem:[#allocation4 + $0x10] sm:$0xff] %vm886_vm1, %v4955_v43  ;;  %894 = vst.msk [vmem:[#allocation4 + $0x18] sm:$0xff] %vm886_vm1, %v4955_v43 }
 0x379   : > { %v1891_v31 = vadd.f32 1e-06, %v1875_v21 }
 0x37a   : > { %v847_v23 = vpop.permute.xlu0 %846  ;;  %v1604_v50 = vpop.permute.xlu1 %1603 }
 0x37b   : > { %v848_v29 = vmul.f32 %v847_v23, %v4527_v41  ;;  %3382 = vrsqrt.f32 %v1891_v31  ;;  %v1626_v32 = vmul.f32 %v1604_v50, %v4531_v1  ;;  %v4558_v31 = vld [vmem:[#allocation17 + $0x58] sm:$0xff] }
 0x37c   : > { %4953 = vst [vmem:[#allocation33_spill] sm:$0xff] %v4558_v31 }
 0x37d   : > { %v3381_v17 = vpop.eup %3380  ;;  %v849_v21 = vadd.f32 %v848_v29, %v845_v24  ;;  %v1642_v5 = vadd.f32 %v1626_v32, %v1578_v34  ;;  %v4561_v29 = vld [vmem:[#allocation17 + $0x60] sm:$0xff] }
 0x37e   : > { %v1614_v44 = vpop.permute.xlu0 %1613  ;;  %v4550_v53 = vmul.f32 %v3381_v17, %v4265_v6  ;;  %v1606_v61 = vpop.permute.xlu1 %1605  ;;  %v4563_v6 = vld [vmem:[#allocation15 + $0x58] sm:$0xff]  ;;  %v4571_v32 = vld [vmem:[#allocation15 + $0x60] sm:$0xff]  ;;  %v1629_v17 = vmul.f32 %v1610_v58, %v4561_v29 }
 0x37f   : > { %v850_v23 = vpack.c.bf16 %v849_v21, %v849_v21  ;;  %v1653_v56 = vpack.c.bf16 %v1642_v5, %v1641_v0  ;;  %v1627_v7 = vmul.f32 %v1606_v61, %v4552_v30  ;;  %4954 = vst [vmem:[#allocation34_spill] sm:$0xff] %v4563_v6  ;;  %v1579_v0 = vmul.f32 %v4372_v19, %v4556_v49  ;;  %v4573_v61 = vld [vmem:[#allocation17 + $0x68] sm:$0xff] }
 0x380   : > { %4952 = vst [vmem:[#allocation32_spill] sm:$0xff] %v4550_v53  ;;  %1968 = vrot.lane.b32.xlu0 %v4550_v53, %s3730_s15  ;;  %v1580_v5 = vmul.f32 %v4382_v16, %v4563_v6  ;;  %4956 = vst [vmem:[#allocation35_spill] sm:$0xff] %v4573_v61  ;;  %v4576_v53 = vld [vmem:[#allocation15 + $0x68] sm:$0xff]  ;;  %v1581_v16 = vmul.f32 %v4362_v40, %v4571_v32  ;;  %v4591_v40 = vld [vmem:[#allocation15 + $0x70] sm:$0xff] }
 0x381   : > { %v852_v37 = vrot.slane %v850_v23, 4  ;;  %2974 = vmatpush3.bf16.xpose.msra.mxu0 %v1653_v56  ;;  %v1643_v21 = vadd.f32 %v1627_v7, %v1579_v0  ;;  %4957 = vst [vmem:[#allocation36_spill] sm:$0xff] %v4576_v53  ;;  %v3256_v58 = vld [vmem:[#allocation12 + $0x8] ss:$16 sps:$4 sm:$0xff]   ;;  %v3258_v7 = vld [vmem:[#allocation12 + $0xc] ss:$16 sps:$4 sm:$0xff]  }
 0x382   : > { %v1941_v24 = vpop.permute.xlu0 %1940  ;;  %v1608_v50 = vpop.permute.xlu1 %1607  ;;  %2975 = vmatprep.subr.bf16.mxu0 %v4955_v43  ;;  %v1645_v0 = vadd.f32 %v1629_v17, %v1581_v16  ;;  %1268 = vmatprep.subr.bf16.mxu1 %v3258_v7  ;;  %v3259_v17 = vld [vmem:[#allocation12 + $0x28] ss:$16 sps:$4 sm:$0xff]  }
 0x383   : > { %854 = vst [vmem:[#allocation2] sm:$0xf0] %v852_v37  ;;  %v1628_v34 = vmul.f32 %v1608_v50, %v4558_v31  ;;  %v1582_v31 = vmul.f32 %v4389_v25, %v4576_v53  ;;  %1269 = vmatpush1.bf16.msra.mxu1 %v3256_v58  ;;  %v3262_v58 = vld [vmem:[#allocation12 + $0x48] ss:$16 sps:$4 sm:$0xff]   ;;  %v1972_v53 = vmul.f32 %v1941_v24, %v4437_v42 }
 0x384   : > { %v3265_v24 = vld [vmem:[#allocation12 + $0x68] ss:$16 sps:$4 sm:$0xff]  }
 0x385   : > { %v3383_v56 = vpop.eup %3382  ;;  %v1644_v23 = vadd.f32 %v1628_v34, %v1580_v5 }
 0x386   : > { %v1945_v37 = vpop.permute.xlu0 %1944  ;;  %v1612_v1 = vpop.permute.xlu1 %1611  ;;  %v4579_v19 = vmul.f32 %v3383_v56, %v4271_v13  ;;  %v3261_v13 = vld [vmem:[#allocation12 + $0x2c] ss:$16 sps:$4 sm:$0xff]   ;;  %v4588_v56 = vld [vmem:[#allocation17 + $0x70] sm:$0xff] }
 0x387   : > { %v1654_v50 = vpack.c.bf16 %v1644_v23, %v1643_v21  ;;  %v1630_v6 = vmul.f32 %v1612_v1, %v4573_v61  ;;  %v831_v1 = vmul.f32 %v4277_v45, %v4537_v59  ;;  %1270 = vmatprep.subr.bf16.mxu1 %v3261_v13  ;;  %v3264_v23 = vld [vmem:[#allocation12 + $0x4c] ss:$16 sps:$4 sm:$0xff]   ;;  %v1631_v16 = vmul.f32 %v1614_v44, %v4588_v56 }
 0x388   : > { %4958 = vst [vmem:[#allocation37_spill] sm:$0xff] %v4579_v19  ;;  %1970 = vrot.lane.b32.xlu1 %v4579_v19, %s3730_s15  ;;  %1271 = vmatpush1.bf16.msra.mxu1 %v3259_v17  ;;  %v3267_v61 = vld [vmem:[#allocation12 + $0x6c] ss:$16 sps:$4 sm:$0xff]   ;;  %v1925_v17 = vmul.f32 %v4291_v3, %v4457_v28  ;;  %v1926_v3 = vmul.f32 %v4308_v10, %v4469_v46  ;;  %s3734_s15 = smov [#allocation18]  }
 0x389   : > { %v1646_v5 = vadd.f32 %v1630_v6, %v1582_v31  ;;  %2976 = vmatpush3.bf16.xpose.msra.mxu0 %v1654_v50  ;;  %v4596_v31 = vld [vmem:[#allocation15 + $0x78] sm:$0xff]  ;;  %1272 = vmatprep.subr.bf16.mxu1 %v3264_v23  ;;  %v1927_v28 = vmul.f32 %v4316_v57, %v4471_v63  ;;  %v1928_v57 = vmul.f32 %v4324_v2, %v4491_v47  ;;  %s3620_s28 = sshll.u32 %s3734_s15, 4  ;;  %s3621_s28 = int_to_ptr.vmem [resolvable:$false] %s3620_s28 }
 0x38a   : > { %v1949_v34 = vpop.permute.xlu0 %1948  ;;  %v833_v62 = vpop.permute.xlu1 %832  ;;  %2977 = vmatprep.subr.bf16.mxu0 %v4955_v43  ;;  %v4598_v6 = vld [vmem:[#allocation17 + $0x78] sm:$0xff]  ;;  %v1584_v45 = vmul.f32 %v4402_v60, %v4596_v31  ;;  %v1924_v60 = vmul.f32 %v4295_v12, %v4445_v48  ;;  %v1930_v2 = vmul.f32 %v4410_v15, %v4508_v8  ;;  %s3622_s3 = scalar_lea.vmem %s3621_s28, 256  ;;  %p3623_p2 = scmp.lt.s32.totalorder %s4832_s12, %s3621_s28 }
 0x38b   : > { %v1655_v25 = vpack.c.bf16 %v1646_v5, %v1645_v0  ;;  %v834_v21 = vmul.f32 %v833_v62, %v4527_v41  ;;  %v1583_v0 = vmul.f32 %v4379_v26, %v4591_v40  ;;  %v1932_v26 = vmul.f32 %v4418_v54, %v4529_v11  ;;  %v4959_v8 = vld [vmem:[#allocation31_spill] sm:$0xff] }
 0x38c   : > { %1273 = vmatpush1.bf16.msra.mxu1 %v3262_v58  ;;  %v1988_v54 = vadd.f32 %v1972_v53, %v1924_v60  ;;  %v4962_v60 = vld [vmem:[#allocation34_spill] sm:$0xff] }
 0x38d   : > { %v835_v50 = vadd.f32 %v834_v21, %v831_v1  ;;  %v1647_v13 = vadd.f32 %v1631_v16, %v1583_v0  ;;  %1274 = vmatprep.subr.bf16.mxu1 %v3267_v61  ;;  %v1934_v16 = vmul.f32 %v4425_v18, %v4556_v49 }
 0x38e   : > { %v1953_v7 = vpop.permute.xlu0 %1952  ;;  %v1616_v19 = vpop.permute.xlu1 %1615 }
 0x38f   : > { %v836_v5 = vpack.c.bf16 %v835_v50, %v835_v50  ;;  %v1632_v62 = vmul.f32 %v1616_v19, %v4598_v6 }
 0x390   : > { %1275 = vmatpush1.bf16.msra.mxu1 %v3265_v24 }
 0x391   : > { %837 = vst [vmem:[#allocation2] sm:$0xf] %v836_v5  ;;  %v1648_v44 = vadd.f32 %v1632_v62, %v1584_v45  ;;  %2978 = vmatpush3.bf16.xpose.msra.mxu0 %v1655_v25  ;;  %v1978_v5 = vmul.f32 %v1953_v7, %v4506_v36 }
 0x392   : > { %v1957_v1 = vpop.permute.xlu0 %1956  ;;  %v1943_v50 = vpop.permute.xlu1 %1942  ;;  %2979 = vmatprep.subr.bf16.mxu0 %v4955_v43 }
 0x393   : > { %v1980_v21 = vmul.f32 %v1957_v1, %v4522_v20  ;;  %v1656_v19 = vpack.c.bf16 %v1648_v44, %v1647_v13  ;;  %v1973_v42 = vmul.f32 %v1943_v50, %v4450_v35  ;;  %v1974_v20 = vmul.f32 %v1945_v37, %v4461_v4  ;;  %v4960_v44 = vld [vmem:[#allocation27_spill] sm:$0xff] }
 0x394   : > { %v1976_v37 = vmul.f32 %v1949_v34, %v4489_v55  ;;  %v1994_v36 = vadd.f32 %v1978_v5, %v1930_v2  ;;  %v1933_v1 = vmul.f32 %v4960_v44, %v4959_v8  ;;  %v3409_v2 = vld [vmem:[%s4093_s17 + $0x8] sm:$0xff]  }
 0x395   : > { %v4616_v25 = vadd.f32 %v1980_v21, %v1932_v26  ;;  %v1989_v11 = vadd.f32 %v1973_v42, %v1925_v17  ;;  %v1990_v4 = vadd.f32 %v1974_v20, %v1926_v3  ;;  %v4964_v42 = vld [vmem:[#allocation33_spill] sm:$0xff] }
 0x396   : > { %v1961_v23 = vpop.permute.xlu0 %1960  ;;  %v1947_v48 = vpop.permute.xlu1 %1946  ;;  %v1992_v34 = vadd.f32 %v1976_v37, %v1928_v57  ;;  %v3276_v57 = vld [vmem:[#allocation12 + $0xcc] ss:$16 sps:$4 sm:$0xff]  }
 0x397   : > { %v1982_v12 = vmul.f32 %v1961_v23, %v4552_v30  ;;  %v2004_v35 = vpack.c.bf16 %v1989_v11, %v1988_v54  ;;  %v1975_v61 = vmul.f32 %v1947_v48, %v4473_v9  ;;  %v1936_v30 = vmul.f32 %v4432_v39, %v4571_v32  ;;  %v4965_v23 = vld [vmem:[#allocation36_spill] sm:$0xff]  ;;  %v4967_v48 = vld [vmem:[#allocation35_spill] sm:$0xff] }
 0x398   : > { %v1929_v9 = vmul.f32 %v4332_v22, %v4493_v14  ;;  %v1931_v22 = vmul.f32 %v4435_v33, %v4510_v51  ;;  %v4961_v33 = vld [vmem:[#allocation30_spill] sm:$0xff] }
 0x399   : > { %v4627_v53 = vadd.f32 %v1982_v12, %v1934_v16  ;;  %v1991_v0 = vadd.f32 %v1975_v61, %v1927_v28  ;;  %2980 = vmatpush3.bf16.xpose.msra.mxu0 %v1656_v19  ;;  %v4963_v19 = vld [vmem:[#allocation28_spill] sm:$0xff]  ;;  %v4966_v16 = vld [vmem:[#allocation29_spill] sm:$0xff]  ;;  %v4968_v61 = vld [vmem:[#allocation26_spill] sm:$0xff] }
 0x39a   : > { %v1965_v18 = vpop.permute.xlu0 %1964  ;;  %v1951_v46 = vpop.permute.xlu1 %1950  ;;  %3005 = vmatprep.subr.bf16.mxu0 %v4955_v43  ;;  %v1935_v17 = vmul.f32 %v4963_v19, %v4962_v60  ;;  %v1937_v12 = vmul.f32 %v4966_v16, %v4965_v23 }
 0x39b   : > { %v1984_v10 = vmul.f32 %v1965_v18, %v4561_v29  ;;  %v2005_v63 = vpack.c.bf16 %v1991_v0, %v1990_v4  ;;  %v1977_v55 = vmul.f32 %v1951_v46, %v4495_v27  ;;  %v876_v29 = vmul.f32 %v4280_v52, %v4537_v59  ;;  %v1665_v27 = vld [vmem:[#allocation2] sm:$0xff] }
 0x39c   : > { %v862_v4 = vmul.f32 %v4968_v61, %v4537_v59  ;;  %v3270_v59 = vld [vmem:[#allocation12 + $0x8c] ss:$16 sps:$4 sm:$0xff]  }
 0x39d   : > { %v2000_v49 = vadd.f32 %v1984_v10, %v1936_v30  ;;  %v1993_v45 = vadd.f32 %v1977_v55, %v1929_v9  ;;  %1276 = vmatprep.subr.bf16.mxu1 %v3270_v59  ;;  %v3271_v30 = vld [vmem:[#allocation12 + $0xa8] ss:$16 sps:$4 sm:$0xff]   ;;  %v3273_v10 = vld [vmem:[#allocation12 + $0xac] ss:$16 sps:$4 sm:$0xff]   ;;  %v4969_v9 = vld [vmem:[#allocation32_spill] sm:$0xff] }
 0x39e   : > { %v878_v39 = vpop.permute.xlu0 %877  ;;  %v1955_v62 = vpop.permute.xlu1 %1954  ;;  %v1938_v55 = vmul.f32 %v4969_v9, %v4591_v40  ;;  %v3408_v40 = vld [vmem:[%s4093_s17] sm:$0xff]  }
 0x39f   : > { %v879_v32 = vmul.f32 %v878_v39, %v4527_v41  ;;  %v2006_v47 = vpack.c.bf16 %v1993_v45, %v1992_v34  ;;  %v1979_v14 = vmul.f32 %v1955_v62, %v4512_v38  ;;  %v3274_v45 = vld [vmem:[#allocation12 + $0xc8] ss:$16 sps:$4 sm:$0xff]   ;;  %v3279_v39 = vld [vmem:[#allocation12 + $0xec] ss:$16 sps:$4 sm:$0xff]  }
 0x3a0   : > { %2982 = vmatmul.mubr.bf16.vlgmr.msra.gmra.mrb[36].mxu0 %v1665_v27  ;;  %v3277_v62 = vld [vmem:[#allocation12 + $0xe8] ss:$16 sps:$4 sm:$0xff]  }
 0x3a1   : > { %v880_v58 = vadd.f32 %v879_v32, %v876_v29  ;;  %v1995_v7 = vadd.f32 %v1979_v14, %v1931_v22  ;;  %3006 = vmatpush3.bf16.xpose.msra.mxu0 %v2004_v35  ;;  %3021 = vmatprep.mubr.msk.bf16.mxu0 %vm3732_vm0, %v4955_v43  ;;  %v3411_v22 = vld [vmem:[%s4093_s17 + $0x18] sm:$0xff]   ;;  %v3412_v14 = vld [vmem:[%s4093_s17 + $0x20] sm:$0xff]   ;;  %v3413_v27 = vld [vmem:[%s4093_s17 + $0x28] sm:$0xff]  }
 0x3a2   : > { %v1959_v13 = vpop.permute.xlu1 %1958  ;;  %3007 = vmatprep.subr.bf16.mxu0 %v4955_v43 }
 0x3a3   : > { %v881_v52 = vpack.c.bf16 %v880_v58, %v880_v58  ;;  %v2007_v15 = vpack.c.bf16 %v1995_v7, %v1994_v36  ;;  %v1981_v51 = vmul.f32 %v1959_v13, %v4961_v33  ;;  %v3414_v58 = vld [vmem:[%s4093_s17 + $0x30] sm:$0xff]   ;;  %v3415_v36 = vld [vmem:[%s4093_s17 + $0x38] sm:$0xff]   ;;  %v1413_v7 = vlaneseq }
 0x3a4   : > { %v3733_v13 = vmov -1e+30  }
 0x3a5   : > { %v883_v38 = vrot.slane %v881_v52, 4  ;;  %v1997_v26 = vadd.f32 %v1981_v51, %v1933_v1  ;;  %v1414_v52 = vshrl.u32 %v1413_v7, 7  ;;  %887 = vst.msk [vmem:[#allocation3] sm:$0xff] %vm886_vm1, %v3733_v13  ;;  %888 = vst.msk [vmem:[#allocation3 + $0x8] sm:$0xff] %vm886_vm1, %v3733_v13  ;;  %v1417_v8 = vand.u32 127, %v1413_v7 }
 0x3a6   : > { %v1963_v21 = vpop.permute.xlu1 %1962  ;;  %889 = vst.msk [vmem:[#allocation3 + $0x10] sm:$0xff] %vm886_vm1, %v3733_v13  ;;  %890 = vst.msk [vmem:[#allocation3 + $0x18] sm:$0xff] %vm886_vm1, %v3733_v13 }
 0x3a7   : > { %885 = vst [vmem:[#allocation2 + $0x8] sm:$0xf0] %v883_v38  ;;  %v2008_v50 = vpack.c.bf16 %v1997_v26, %v4616_v25  ;;  %v1983_v24 = vmul.f32 %v1963_v21, %v4964_v42  ;;  %v1423_v44 = vand.u32 7, %v1414_v52  ;;  %vm1451_vm3 = vcmp.lt.s32.totalorder %v1417_v8, 8 }
 0x3a9   : > { %v1999_v54 = vadd.f32 %v1983_v24, %v1935_v17  ;;  %3008 = vmatpush3.bf16.xpose.msra.mxu0 %v2005_v63  ;;  %vm1449_vm2 = vcmp.le.s32.totalorder %v1417_v8, %v1423_v44 }
 0x3aa   : > { %v1967_v20 = vpop.permute.xlu1 %1966  ;;  %3009 = vmatprep.subr.bf16.mxu0 %v4955_v43  ;;  %vm1452_vm5 = vmand %vm1449_vm2, %vm1451_vm3 }
 0x3ab   : > { %v2009_v11 = vpack.c.bf16 %v1999_v54, %v4627_v53  ;;  %v1985_v3 = vmul.f32 %v1967_v20, %v4967_v48  ;;  %v1454_v33 = vsel %vm1452_vm5, 0.0, %v3733_v13 }
 0x3ad   : > { %v2001_v35 = vadd.f32 %v1985_v3, %v1937_v12 }
 0x3ae   : > { %v864_v28 = vpop.permute.xlu1 %863 }
 0x3af   : > { %v2010_v25 = vpack.c.bf16 %v2001_v35, %v2000_v49  ;;  %v865_v37 = vmul.f32 %v864_v28, %v4527_v41  ;;  %v3268_v41 = vld [vmem:[#allocation12 + $0x88] ss:$16 sps:$4 sm:$0xff]  }
 0x3b0   : > { %1277 = vmatpush1.bf16.msra.mxu1 %v3268_v41  ;;  %v4970_v49 = vld [vmem:[#allocation37_spill] sm:$0xff] }
 0x3b1   : > { %v866_v0 = vadd.f32 %v865_v37, %v862_v4  ;;  %3010 = vmatpush3.bf16.xpose.msra.mxu0 %v2006_v47  ;;  %1278 = vmatprep.subr.bf16.mxu1 %v3273_v10  ;;  %v1939_v34 = vmul.f32 %v4970_v49, %v4596_v31  ;;  %v3410_v47 = vld [vmem:[%s4093_s17 + $0x10] sm:$0xff]   ;;  %v4737_v10 = vld [vmem:[#allocation3] sm:$0xff]  ;;  %s3616_s17 = scalar_lea.vmem %s4832_s12, 128 }
 0x3b2   : > { %3011 = vmatprep.subr.bf16.mxu0 %v4955_v43  ;;  %p3617_p6 = scmp.ne.s32.totalorder %s4832_s12, %s3616_s17  ;;  %p3624_p4 = scmp.lt.s32.totalorder %s3622_s3, %s3616_s17 }
 0x3b3   : > { %v867_v18 = vpack.c.bf16 %v866_v0, %v866_v0 }
 0x3b4   : > { %1279 = vmatpush1.bf16.msra.mxu1 %v3271_v30  ;;  %p3618_p7 = pnand %p3617_p6, %p4974_p0  ;;  %p3625_p9 = por %p3624_p4, %p3623_p2 }
 0x3b5   : > { %868 = vst [vmem:[#allocation2 + $0x8] sm:$0xf] %v867_v18  ;;  %1280 = vmatprep.subr.bf16.mxu1 %v3276_v57 }
 0x3b6   : > { %p3619_p5 = pneg %p3618_p7 }
 0x3b8   : > { %1281 = vmatpush1.bf16.msra.mxu1 %v3274_v45  ;;  %p3626_p1 = pnand %p3625_p9, %p3619_p5 }
 0x3b9   : > { %3012 = vmatpush3.bf16.xpose.msra.mxu0 %v2007_v15  ;;  %1282 = vmatprep.subr.bf16.mxu1 %v3279_v39  ;;  %v1415_v15 = vadd.s32 8, %v1414_v52 }
 0x3ba   : > { %3013 = vmatprep.subr.bf16.mxu0 %v4955_v43 }
 0x3bb   : > { %v1430_v1 = vand.u32 7, %v1415_v15 }
 0x3bc   : > { %1283 = vmatpush1.bf16.msra.mxu1 %v3277_v62  ;;  %v2020_v31 = vld [vmem:[#allocation2 + $0x8] sm:$0xff] }
 0x3bd   : > { %2985 = vmatprep.subr.bf16.mxu1 %v4955_v43  ;;  %vm1450_vm4 = vcmp.le.s32.totalorder %v1417_v8, %v1430_v1 }
 0x3be   : > { %vm1453_vm6 = vmand %vm1450_vm4, %vm1451_vm3 }
 0x3bf   : > { %1301 = vmatmul.mubr.bf16.vlgmr.msra.gmra.mrb[4].mxu1 %v3408_v40  ;;  %v1455_v38 = vsel %vm1453_vm6, 0.0, %v3733_v13 }
 0x3c1   : > { %3014 = vmatpush3.bf16.xpose.msra.mxu0 %v2008_v50 }
 0x3c2   : > { %3015 = vmatprep.subr.bf16.mxu0 %v4955_v43 }
 0x3c9   : > { %3016 = vmatpush3.bf16.xpose.msra.mxu0 %v2009_v11 }
 0x3ca   : > { %3017 = vmatprep.subr.bf16.mxu0 %v4955_v43 }
 0x3d1   : > { %3018 = vmatpush3.bf16.xpose.msra.mxu0 %v2010_v25 }
 0x3d2   : > { %3019 = vmatprep.subr.bf16.mxu0 %v4955_v43 }
 0x3f2   : > { %v1969_v53 = vpop.permute.xlu0 %1968 }
 0x3f3   : > { %v1986_v46 = vmul.f32 %v1969_v53, %v4588_v56 }
 0x3f5   : > { %v2002_v29 = vadd.f32 %v1986_v46, %v1938_v55  ;;  %v4743_v55 = vld [vmem:[#allocation3 + $0x8] sm:$0xff] }
 0x3fa   : > { %v1971_v63 = vpop.permute.xlu1 %1970 }
 0x3fb   : > { %v1987_v5 = vmul.f32 %v1971_v63, %v4598_v6  ;;  %v4971_v6 = vmov 0  }
 0x3fc   : > { %1310 = vmatprep.mubr.bf16.mxu1 %v4971_v6 }
 0x3fd   : > { %v2003_v32 = vadd.f32 %v1987_v5, %v1939_v34  ;;  %1311 = vmatmul.mubr.bf16.gmra.mrb[8].mxu1 %v3409_v2 }
 0x3fe   : > { %1320 = vmatprep.mubr.bf16.mxu1 %v4971_v6 }
 0x3ff   : > { %v2011_v56 = vpack.c.bf16 %v2003_v32, %v2002_v29 }
 0x401   : > { %3020 = vmatpush3.bf16.xpose.msra.mxu0 %v2011_v56 }
 0x405   : > { %1321 = vmatmul.mubr.bf16.gmra.mrb[12].mxu1 %v3410_v47 }
 0x406   : > { %1330 = vmatprep.mubr.bf16.mxu1 %v4971_v6 }
 0x408   : > { %3022 = vmatmul.mubr.bf16.vlgmr.msra.gmra.mrb[40].mxu0 %v2020_v31 }
 0x40d   : > { %1331 = vmatmul.mubr.bf16.gmra.mrb[16].mxu1 %v3411_v22 }
 0x40e   : > { %1340 = vmatprep.mubr.bf16.mxu1 %v4971_v6 }
 0x415   : > { %1341 = vmatmul.mubr.bf16.gmra.mrb[20].mxu1 %v3412_v14 }
 0x416   : > { %1350 = vmatprep.mubr.bf16.mxu1 %v4971_v6 }
 0x41d   : > { %1351 = vmatmul.mubr.bf16.gmra.mrb[24].mxu1 %v3413_v27 }
 0x41e   : > { %1360 = vmatprep.mubr.bf16.mxu1 %v4971_v6 }
 0x425   : > { %1361 = vmatmul.mubr.bf16.gmra.mrb[28].mxu1 %v3414_v58 }
 0x426   : > { %1370 = vmatprep.mubr.bf16.mxu1 %v4971_v6 }
 0x42d   : > { %1371 = vmatmul.mubr.bf16.gmra.mrb[32].mxu1 %v3415_v36 }
 0x42e   : > { %3001 = vmatprep.mubr.msk.bf16.mxu1 %vm3732_vm0, %v4955_v43 }
 0x473   : > { %v1700_v51 = vpop.f32.mrb[36].mxu0 }
 0x474   : > { %v4707_v26 = vadd.f32 %v1700_v51, %v1454_v33  ;;  %v2983_v21 = vpop.f32.mrb[37].mxu0 }
 0x475   : > { %v1703_v50 = vpop.f32.mrb[38].mxu0 }
 0x476   : > { %v4709_v60 = vadd.f32 %v1703_v50, %v1455_v38  ;;  %1709 = vmax.xlane.f32.xlu0 %v4707_v26  ;;  %v2984_v19 = vpop.f32.mrb[39].mxu0 }
 0x477   : > { %v2062_v19 = vld [vmem:[#allocation3 + $0x10] sm:$0xff] }
 0x478   : > { %1711 = vmax.xlane.f32.xlu1 %v4709_v60 }
 0x492   : > { %v1302_v23 = vpop.f32.mrb[4].mxu1 }
 0x493   : > { %v4719_v16 = vpop.f32.mrb[5].mxu1 }
 0x494   : > { %v1306_v12 = vpop.f32.mrb[6].mxu1 }
 0x495   : > { %v1657_v48 = vpack.c.bf16 %v1306_v12, %v1302_v23  ;;  %v4721_v3 = vpop.f32.mrb[7].mxu1 }
 0x496   : > { %v2012_v35 = vpack.c.bf16 %v4721_v3, %v4719_v16 }
 0x497   : > { %2986 = vmatpush3.bf16.msra.mxu1 %v1657_v48 }
 0x498   : > { %2987 = vmatprep.subr.bf16.mxu1 %v4955_v43 }
 0x4d0   : > { %v1312_v28 = vpop.f32.mrb[8].mxu1 }
 0x4d1   : > { %v4725_v25 = vpop.f32.mrb[9].mxu1 }
 0x4d2   : > { %v1316_v61 = vpop.f32.mrb[10].mxu1 }
 0x4d3   : > { %v1658_v4 = vpack.c.bf16 %v1316_v61, %v1312_v28  ;;  %v4728_v37 = vpop.f32.mrb[11].mxu1 }
 0x4d4   : > { %v2013_v0 = vpack.c.bf16 %v4728_v37, %v4725_v25 }
 0x4d5   : > { %2988 = vmatpush3.bf16.msra.mxu1 %v1658_v4 }
 0x4d6   : > { %2989 = vmatprep.subr.bf16.mxu1 %v4955_v43 }
 0x4d8   : > { %v1322_v18 = vpop.f32.mrb[12].mxu1 }
 0x4d9   : > { %v4732_v59 = vpop.f32.mrb[13].mxu1 }
 0x4da   : > { %v1326_v41 = vpop.f32.mrb[14].mxu1 }
 0x4db   : > { %v2055_v17 = vpop.f32.mrb[40].mxu0  ;;  %v1659_v53 = vpack.c.bf16 %v1326_v41, %v1322_v18  ;;  %v4735_v30 = vpop.f32.mrb[15].mxu1 }
 0x4dc   : > { %v4713_v42 = vadd.f32 %v2055_v17, %v1454_v33  ;;  %v3023_v24 = vpop.f32.mrb[41].mxu0  ;;  %v2014_v46 = vpack.c.bf16 %v4735_v30, %v4732_v59 }
 0x4dd   : > { %v2058_v54 = vpop.f32.mrb[42].mxu0  ;;  %2990 = vmatpush3.bf16.msra.mxu1 %v1659_v53 }
 0x4de   : > { %2064 = vmax.xlane.f32.xlu0 %v4713_v42  ;;  %v3024_v20 = vpop.f32.mrb[43].mxu0  ;;  %v4716_v11 = vadd.f32 %v2058_v54, %v1455_v38  ;;  %2991 = vmatprep.subr.bf16.mxu1 %v4955_v43  ;;  %v2063_v54 = vld [vmem:[#allocation3 + $0x18] sm:$0xff] }
 0x4e0   : > { %v1332_v57 = vpop.f32.mrb[16].mxu1 }
 0x4e1   : > { %v4741_v63 = vpop.f32.mrb[17].mxu1 }
 0x4e2   : > { %2066 = vmax.xlane.f32.xlu0 %v4716_v11  ;;  %v1336_v49 = vpop.f32.mrb[18].mxu1 }
 0x4e3   : > { %v1660_v5 = vpack.c.bf16 %v1336_v49, %v1332_v57  ;;  %v4749_v45 = vpop.f32.mrb[19].mxu1 }
 0x4e4   : > { %v2015_v29 = vpack.c.bf16 %v4749_v45, %v4741_v63 }
 0x4e5   : > { %2992 = vmatpush3.bf16.msra.mxu1 %v1660_v5 }
 0x4e6   : > { %2993 = vmatprep.subr.bf16.mxu1 %v4955_v43 }
 0x4e8   : > { %v1342_v32 = vpop.f32.mrb[20].mxu1 }
 0x4e9   : > { %v4761_v40 = vpop.f32.mrb[21].mxu1 }
 0x4ea   : > { %v1346_v31 = vpop.f32.mrb[22].mxu1 }
 0x4eb   : > { %v1661_v2 = vpack.c.bf16 %v1346_v31, %v1342_v32  ;;  %v4769_v47 = vpop.f32.mrb[23].mxu1  ;;  %v3283_v31 = vld [vmem:[#allocation14 + $0x8] sm:$0xff]  }
 0x4ec   : > { %v2016_v58 = vpack.c.bf16 %v4769_v47, %v4761_v40  ;;  %v3282_v40 = vld [vmem:[#allocation14 + $0x48] sm:$0xff]  }
 0x4ed   : > { %2994 = vmatpush3.bf16.msra.mxu1 %v1661_v2 }
 0x4ee   : > { %2995 = vmatprep.subr.bf16.mxu1 %v4955_v43 }
 0x4f0   : > { %v1352_v22 = vpop.f32.mrb[24].mxu1 }
 0x4f1   : > { %v4771_v14 = vpop.f32.mrb[25].mxu1 }
 0x4f2   : > { %v1356_v27 = vpop.f32.mrb[26].mxu1 }
 0x4f3   : > { %v1662_v36 = vpack.c.bf16 %v1356_v27, %v1352_v22  ;;  %v1358_v7 = vpop.f32.mrb[27].mxu1  ;;  %v3284_v22 = vld [vmem:[#allocation14 + $0x50] sm:$0xff]   ;;  %v3286_v27 = vld [vmem:[#allocation14 + $0x58] sm:$0xff]  }
 0x4f4   : > { %v2017_v52 = vpack.c.bf16 %v1358_v7, %v4771_v14  ;;  %v3285_v14 = vld [vmem:[#allocation14 + $0x10] sm:$0xff]   ;;  %v3288_v7 = vld [vmem:[#allocation14 + $0x60] sm:$0xff]  }
 0x4f5   : > { %2996 = vmatpush3.bf16.msra.mxu1 %v1662_v36  ;;  %v3287_v36 = vld [vmem:[#allocation14 + $0x18] sm:$0xff]  }
 0x4f6   : > { %2997 = vmatprep.subr.bf16.mxu1 %v4955_v43 }
 0x4f8   : > { %v1362_v13 = vpop.f32.mrb[28].mxu1 }
 0x4f9   : > { %v1364_v15 = vpop.f32.mrb[29].mxu1 }
 0x4fa   : > { %v1366_v8 = vpop.f32.mrb[30].mxu1 }
 0x4fb   : > { %v1663_v44 = vpack.c.bf16 %v1366_v8, %v1362_v13  ;;  %v1368_v1 = vpop.f32.mrb[31].mxu1  ;;  %v3289_v13 = vld [vmem:[#allocation14 + $0x20] sm:$0xff]  }
 0x4fc   : > { %v2018_v33 = vpack.c.bf16 %v1368_v1, %v1364_v15  ;;  %v3290_v15 = vld [vmem:[#allocation14 + $0x68] sm:$0xff]   ;;  %v3292_v1 = vld [vmem:[#allocation14 + $0x70] sm:$0xff]  }
 0x4fd   : > { %2998 = vmatpush3.bf16.msra.mxu1 %v1663_v44  ;;  %v3291_v44 = vld [vmem:[#allocation14 + $0x28] sm:$0xff]  }
 0x4fe   : > { %2999 = vmatprep.subr.bf16.mxu1 %v4955_v43 }
 0x500   : > { %v1372_v51 = vpop.f32.mrb[32].mxu1 }
 0x501   : > { %v1374_v38 = vpop.f32.mrb[33].mxu1 }
 0x502   : > { %v1376_v21 = vpop.f32.mrb[34].mxu1 }
 0x503   : > { %v1710_v9 = vpop.xlane.xlu0 %1709  ;;  %v1664_v50 = vpack.c.bf16 %v1376_v21, %v1372_v51  ;;  %v1378_v28 = vpop.f32.mrb[35].mxu1  ;;  %v3293_v51 = vld [vmem:[#allocation14 + $0x30] sm:$0xff]  }
 0x504   : > { %v4747_v34 = vmax.f32 %v4737_v10, %v1710_v9  ;;  %v2019_v61 = vpack.c.bf16 %v1378_v28, %v1374_v38  ;;  %v3294_v38 = vld [vmem:[#allocation14 + $0x78] sm:$0xff]   ;;  %v3304_v28 = vld [vmem:[#allocation14 + $0xe0] sm:$0xff]  }
 0x505   : > { %v1712_v39 = vpop.xlane.xlu1 %1711  ;;  %3000 = vmatpush3.bf16.msra.mxu1 %v1664_v50  ;;  %v3295_v50 = vld [vmem:[#allocation14 + $0x38] sm:$0xff]  }
 0x506   : > { %v1715_v56 = vsub.f32 %v4737_v10, %v4747_v34  ;;  %1810 = vst.msk [vmem:[#allocation3] sm:$0xff] %vm886_vm1, %v4747_v34  ;;  %v4758_v62 = vmax.f32 %v4743_v55, %v1712_v39  ;;  %1723 = vperm.xlu0 %3174, %v4747_v34   ;;  %3025 = vmatprep.subr.bf16.mxu1 %v4955_v43  ;;  %v3280_v10 = vld [vmem:[#allocation14 + $0x40] sm:$0xff]  }
 0x507   : > { %v3281_v34 = vld [vmem:[#allocation14] sm:$0xff]  }
 0x508   : > { %v1716_v6 = vsub.f32 %v4743_v55, %v4758_v62  ;;  %1811 = vst.msk [vmem:[#allocation3 + $0x8] sm:$0xff] %vm886_vm1, %v4758_v62  ;;  %1728 = vperm.xlu1 %3175, %v4758_v62   ;;  %v1737_v62 = vld [vmem:[#allocation4] sm:$0xff] }
 0x56b   : > { %v2065_v17 = vpop.xlane.xlu0 %2064 }
 0x56c   : > { %v2068_v24 = vmax.f32 %v2062_v19, %v2065_v17  ;;  %v3297_v17 = vld [vmem:[#allocation14 + $0x80] sm:$0xff]  }
 0x56e   : > { %v2070_v20 = vsub.f32 %v2062_v19, %v2068_v24  ;;  %2164 = vst.msk [vmem:[#allocation3 + $0x10] sm:$0xff] %vm886_vm1, %v2068_v24  ;;  %2078 = vperm.xlu1 %3175, %v2068_v24   ;;  %v3296_v19 = vld [vmem:[#allocation14 + $0xc0] sm:$0xff]   ;;  %v3298_v24 = vld [vmem:[#allocation14 + $0xc8] sm:$0xff]  }
 0x56f   : > { %v2067_v23 = vpop.xlane.xlu0 %2066  ;;  %2943 = vmatprep.subr.bf16.mxu0 %v3296_v19 }
 0x570   : > { %v2069_v12 = vmax.f32 %v2063_v54, %v2067_v23  ;;  %v2072_v30 = vmul.f32 1.442695, %v2070_v20  ;;  %2944 = vmatpush3.bf16.msra.mxu0 %v3297_v17  ;;  %v3300_v20 = vld [vmem:[#allocation14 + $0xd0] sm:$0xff]  }
 0x571   : > { %2945 = vmatprep.subr.bf16.mxu0 %v3298_v24  ;;  %v3301_v23 = vld [vmem:[#allocation14 + $0x90] sm:$0xff]  }
 0x572   : > { %v2071_v48 = vsub.f32 %v2063_v54, %v2069_v12  ;;  %2165 = vst.msk [vmem:[#allocation3 + $0x18] sm:$0xff] %vm886_vm1, %v2069_v12  ;;  %2083 = vperm.xlu1 %3175, %v2069_v12   ;;  %v3299_v54 = vld [vmem:[#allocation14 + $0x88] sm:$0xff]   ;;  %v3302_v12 = vld [vmem:[#allocation14 + $0xd8] sm:$0xff]  }
 0x574   : > { %2946 = vmatpush3.bf16.msra.mxu0 %v3299_v54 }
 0x575   : > { %2947 = vmatprep.subr.bf16.mxu0 %v3300_v20 }
 0x578   : > { %2948 = vmatpush3.bf16.msra.mxu0 %v3301_v23 }
 0x579   : > { %2949 = vmatprep.subr.bf16.mxu0 %v3302_v12 }
 0x585   : > { %v1724_v4 = vpop.permute.xlu0 %1723 }
 0x586   : > { %v1731_v18 = vsub.f32 %v4707_v26, %v1724_v4  ;;  %v3306_v4 = vld [vmem:[#allocation14 + $0xe8] sm:$0xff]  }
 0x587   : > { %v1729_v41 = vpop.permute.xlu1 %1728 }
 0x588   : > { %v1733_v53 = vmul.f32 1.442695, %v1731_v18  ;;  %v1732_v57 = vsub.f32 %v4709_v60, %v1729_v41  ;;  %v3307_v41 = vld [vmem:[#allocation14 + $0xa8] sm:$0xff]  }
 0x58a   : > { %v1735_v9 = vmul.f32 1.442695, %v1732_v57  ;;  %3384 = vpow2.f32 %v1733_v53 }
 0x58c   : > { %3386 = vpow2.f32 %v1735_v9 }
 0x594   : > { %v3385_v49 = vpop.eup %3384 }
 0x596   : > { %v3387_v5 = vpop.eup %3386 }
 0x597   : > { %1743 = vadd.xlane.f32.xlu1 %v3387_v5  ;;  %v1764_v39 = vpack.c.bf16 %v3387_v5, %v3385_v49 }
 0x599   : > { %3002 = vmatmul.mubr.bf16.vlgmr.msra.gmra.mrb[36].mxu1 %v1764_v39 }
 0x59a   : > { %3026 = vmatpush3.bf16.msra.mxu1 %v2012_v35  ;;  %3041 = vmatprep.mubr.msk.bf16.mxu1 %vm3732_vm0, %v4955_v43 }
 0x59b   : > { %1741 = vadd.xlane.f32.xlu1 %v3385_v49  ;;  %3027 = vmatprep.subr.bf16.mxu1 %v4955_v43  ;;  %v2092_v49 = vld [vmem:[#allocation4 + $0x10] sm:$0xff] }
 0x59e   : > { %3028 = vmatpush3.bf16.msra.mxu1 %v2013_v0  ;;  %v1719_v0 = vmul.f32 1.442695, %v1716_v6 }
 0x59f   : > { %3029 = vmatprep.subr.bf16.mxu1 %v4955_v43 }
 0x5a2   : > { %3030 = vmatpush3.bf16.msra.mxu1 %v2014_v46 }
 0x5a3   : > { %3031 = vmatprep.subr.bf16.mxu1 %v4955_v43 }
 0x5a6   : > { %3032 = vmatpush3.bf16.msra.mxu1 %v2015_v29  ;;  %v1738_v29 = vld [vmem:[#allocation4 + $0x8] sm:$0xff] }
 0x5a7   : > { %3033 = vmatprep.subr.bf16.mxu1 %v4955_v43 }
 0x5aa   : > { %3034 = vmatpush3.bf16.msra.mxu1 %v2016_v58 }
 0x5ab   : > { %3035 = vmatprep.subr.bf16.mxu1 %v4955_v43 }
 0x5ae   : > { %3036 = vmatpush3.bf16.msra.mxu1 %v2017_v52 }
 0x5af   : > { %3037 = vmatprep.subr.bf16.mxu1 %v4955_v43 }
 0x5b2   : > { %3038 = vmatpush3.bf16.msra.mxu1 %v2018_v33 }
 0x5b3   : > { %3039 = vmatprep.subr.bf16.mxu1 %v4955_v43 }
 0x5b6   : > { %3040 = vmatpush3.bf16.msra.mxu1 %v2019_v61  ;;  %v3305_v61 = vld [vmem:[#allocation14 + $0xa0] sm:$0xff]  }
 0x5b7   : > { %2921 = vmatprep.subr.bf16.mxu1 %v3280_v10 }
 0x5ed   : > { %v2079_v26 = vpop.permute.xlu1 %2078 }
 0x5ee   : > { %v2086_v60 = vsub.f32 %v4713_v42, %v2079_v26  ;;  %v1717_v42 = vmul.f32 1.442695, %v1715_v56  ;;  %v2093_v26 = vld [vmem:[#allocation4 + $0x18] sm:$0xff] }
 0x5f0   : > { %v2088_v16 = vmul.f32 1.442695, %v2086_v60 }
 0x5f1   : > { %v2084_v3 = vpop.permute.xlu1 %2083 }
 0x5f2   : > { %3388 = vpow2.f32 %v2088_v16  ;;  %v2087_v35 = vsub.f32 %v4716_v11, %v2084_v3  ;;  %v2074_v11 = vmul.f32 1.442695, %v2071_v48  ;;  %v3303_v48 = vld [vmem:[#allocation14 + $0x98] sm:$0xff]  }
 0x5f3   : > { %2950 = vmatpush3.bf16.msra.mxu0 %v3303_v48 }
 0x5f4   : > { %v2090_v25 = vmul.f32 1.442695, %v2087_v35  ;;  %2951 = vmatprep.subr.bf16.mxu0 %v3304_v28 }
 0x5f6   : > { %3390 = vpow2.f32 %v2090_v25 }
 0x5f7   : > { %3392 = vpow2.f32 %v1719_v0  ;;  %2952 = vmatpush3.bf16.msra.mxu0 %v3305_v61  ;;  %v3308_v0 = vld [vmem:[#allocation14 + $0xf0] sm:$0xff]  }
 0x5f8   : > { %3394 = vpow2.f32 %v1717_v42  ;;  %2953 = vmatprep.subr.bf16.mxu0 %v3306_v4  ;;  %v3310_v42 = vld [vmem:[#allocation14 + $0xf8] sm:$0xff]  }
 0x5f9   : > { %3396 = vpow2.f32 %v2072_v30 }
 0x5fa   : > { %3398 = vpow2.f32 %v2074_v11  ;;  %v3311_v11 = vld [vmem:[#allocation14 + $0xb8] sm:$0xff]  }
 0x5fb   : > { %2954 = vmatpush3.bf16.msra.mxu0 %v3307_v41 }
 0x5fc   : > { %v3389_v37 = vpop.eup %3388  ;;  %2955 = vmatprep.subr.bf16.mxu0 %v3308_v0 }
 0x5fd   : > { %2096 = vadd.xlane.f32.xlu1 %v3389_v37 }
 0x600   : > { %v3391_v59 = vpop.eup %3390 }
 0x601   : > { %2098 = vadd.xlane.f32.xlu0 %v3391_v59  ;;  %v2118_v43 = vpack.c.bf16 %v3391_v59, %v3389_v37  ;;  %v3393_v46 = vpop.eup %3392 }
 0x602   : > { %v3395_v63 = vpop.eup %3394  ;;  %v1740_v32 = vmul.f32 %v3393_v46, %v1738_v29 }
 0x603   : > { %3042 = vmatmul.mubr.bf16.vlgmr.msra.gmra.mrb[40].mxu1 %v2118_v43  ;;  %v4813_v55 = vpop.eup %3396  ;;  %v1739_v2 = vmul.f32 %v3395_v63, %v1737_v62  ;;  %v3309_v43 = vld [vmem:[#allocation14 + $0xb0] sm:$0xff]  }
 0x604   : > { %v4815_v45 = vpop.eup %3398  ;;  %2922 = vmatpush3.bf16.msra.mxu1 %v3281_v34  ;;  %v2094_v5 = vmul.f32 %v4813_v55, %v2092_v49  ;;  %2956 = vmatpush3.bf16.msra.mxu0 %v3309_v43 }
 0x605   : > { %2923 = vmatprep.subr.bf16.mxu1 %v3282_v40  ;;  %v2095_v16 = vmul.f32 %v4815_v45, %v2093_v26  ;;  %2957 = vmatprep.subr.bf16.mxu0 %v3310_v42 }
 0x608   : > { %2924 = vmatpush3.bf16.msra.mxu1 %v3283_v31  ;;  %2958 = vmatpush3.bf16.msra.mxu0 %v3311_v11 }
 0x609   : > { %2925 = vmatprep.subr.bf16.mxu1 %v3284_v22 }
 0x60c   : > { %2926 = vmatpush3.bf16.msra.mxu1 %v3285_v14 }
 0x60d   : > { %2927 = vmatprep.subr.bf16.mxu1 %v3286_v27 }
 0x60e   : > { %1759 = vperm.xlu1 %3175, %v3393_v46  }
 0x610   : > { %2928 = vmatpush3.bf16.msra.mxu1 %v3287_v36 }
 0x611   : > { %2929 = vmatprep.subr.bf16.mxu1 %v3288_v7 }
 0x612   : > { %1754 = vperm.xlu1 %3175, %v3395_v63  }
 0x614   : > { %2930 = vmatpush3.bf16.msra.mxu1 %v3289_v13 }
 0x615   : > { %2931 = vmatprep.subr.bf16.mxu1 %v3290_v15 }
 0x616   : > { %2108 = vperm.xlu1 %3175, %v4813_v55  }
 0x617   : > { %2113 = vperm.xlu0 %3174, %v4815_v45  }
 0x618   : > { %2932 = vmatpush3.bf16.msra.mxu1 %v3291_v44 }
 0x619   : > { %2933 = vmatprep.subr.bf16.mxu1 %v3292_v1 }
 0x61c   : > { %2934 = vmatpush3.bf16.msra.mxu1 %v3293_v51 }
 0x61d   : > { %2935 = vmatprep.subr.bf16.mxu1 %v3294_v38 }
 0x620   : > { %2936 = vmatpush3.bf16.msra.mxu1 %v3295_v50 }
 0x624   : > { %v1744_v56 = vpop.xlane.xlu1 %1743 }
 0x625   : > { %v1746_v6 = vadd.f32 %v1744_v56, %v1740_v32 }
 0x627   : > { %1749 = vst.msk [vmem:[#allocation4 + $0x8] sm:$0xff] %vm886_vm1, %v1746_v6 }
 0x628   : > { %v1742_v47 = vpop.xlane.xlu1 %1741 }
 0x629   : > { %v1745_v58 = vadd.f32 %v1742_v47, %v1739_v2 }
 0x62b   : > { %1748 = vst.msk [vmem:[#allocation4] sm:$0xff] %vm886_vm1, %v1745_v58 }
 0x62e   : > { %v2174_v52 = vld [vmem:[#allocation4 + $0x8] sm:$0xff] }
 0x62f   : > { %3400 = vrcp.f32 %v2174_v52 }
 0x632   : > { %v2173_v8 = vld [vmem:[#allocation4] sm:$0xff] }
 0x633   : > { %3402 = vrcp.f32 %v2173_v8 }
 0x639   : > { %v3401_v33 = vpop.eup %3400 }
 0x63a   : > { %2188 = vperm.xlu1 %3175, %v3401_v33  }
 0x63d   : > { %v3403_v21 = vpop.eup %3402 }
 0x63e   : > { %2183 = vperm.xlu1 %3175, %v3403_v21  }
 0x66c   : > { %v1799_v18 = vpop.f32.mrb[36].mxu1 }
 0x66d   : > { %v3003_v53 = vpop.f32.mrb[37].mxu1 }
 0x66e   : > { %v1802_v57 = vpop.f32.mrb[38].mxu1 }
 0x66f   : > { %v3004_v9 = vpop.f32.mrb[39].mxu1 }
 0x68a   : > { %v2097_v39 = vpop.xlane.xlu1 %2096 }
 0x68b   : > { %v2100_v60 = vadd.f32 %v2097_v39, %v2094_v5 }
 0x68d   : > { %2102 = vst.msk [vmem:[#allocation4 + $0x10] sm:$0xff] %vm886_vm1, %v2100_v60 }
 0x68e   : > { %v2099_v3 = vpop.xlane.xlu0 %2098  ;;  %v1760_v46 = vpop.permute.xlu1 %1759 }
 0x68f   : > { %v2101_v35 = vadd.f32 %v2099_v3, %v2095_v16  ;;  %v1763_v55 = vmul.f32 0.0, %v1760_v46 }
 0x691   : > { %2103 = vst.msk [vmem:[#allocation4 + $0x18] sm:$0xff] %vm886_vm1, %v2101_v35  ;;  %v1807_v34 = vadd.f32 %v1802_v57, %v1763_v55 }
 0x692   : > { %v1755_v63 = vpop.permute.xlu1 %1754 }
 0x693   : > { %v1762_v10 = vmul.f32 0.0, %v1755_v63 }
 0x694   : > { %v2175_v37 = vld [vmem:[#allocation4 + $0x10] sm:$0xff] }
 0x695   : > { %v1806_v62 = vadd.f32 %v1799_v18, %v1762_v10 }
 0x696   : > { %v2109_v45 = vpop.permute.xlu1 %2108  ;;  %v2114_v36 = vpop.permute.xlu0 %2113 }
 0x697   : > { %v2116_v2 = vmul.f32 0.0, %v2109_v45  ;;  %v2117_v7 = vmul.f32 0.0, %v2114_v36 }
 0x698   : > { %v2176_v25 = vld [vmem:[#allocation4 + $0x18] sm:$0xff] }
 0x699   : > { %3404 = vrcp.f32 %v2176_v25 }
 0x69a   : > { %3406 = vrcp.f32 %v2175_v37 }
 0x6a3   : > { %v3405_v59 = vpop.eup %3404 }
 0x6a4   : > { %2198 = vperm.xlu0 %3174, %v3405_v59   ;;  %v3407_v30 = vpop.eup %3406 }
 0x6a8   : > { %2193 = vperm.xlu0 %3174, %v3407_v30  }
 0x6b9   : > { %v2189_v29 = vpop.permute.xlu1 %2188 }
 0x6ba   : > { %v2202_v32 = vmul.f32 %v2189_v29, %v1807_v34 }
 0x6bc   : > { %v2206_v56 = vpack.c.bf16 %v2202_v32, %v2202_v32 }
 0x6bd   : > { %v2184_v40 = vpop.permute.xlu1 %2183 }
 0x6be   : > { %v2201_v31 = vmul.f32 %v2184_v40, %v1806_v62  ;;  %2497 = vmatprep.mubr.bf16.mxu1 %v2206_v56 }
 0x6c0   : > { %v2205_v6 = vpack.c.bf16 %v2201_v31, %v2201_v31 }
 0x6c2   : > { %2498 = vmatmul.mubr.bf16.vlgmr.msra.gmra.mrb[44].mxu1 %v2205_v6 }
 0x6d6   : > { %v2153_v47 = vpop.f32.mrb[40].mxu1 }
 0x6d7   : > { %v2160_v22 = vadd.f32 %v2153_v47, %v2116_v2  ;;  %v3043_v14 = vpop.f32.mrb[41].mxu1 }
 0x6d8   : > { %v2156_v27 = vpop.f32.mrb[42].mxu1 }
 0x6d9   : > { %v3044_v58 = vpop.f32.mrb[43].mxu1  ;;  %v2161_v52 = vadd.f32 %v2156_v27, %v2117_v7 }
 0x723   : > { %v2199_v13 = vpop.permute.xlu0 %2198 }
 0x724   : > { %v2204_v15 = vmul.f32 %v2199_v13, %v2161_v52 }
 0x726   : > { %v2208_v8 = vpack.c.bf16 %v2204_v15, %v2204_v15 }
 0x727   : > { %v2194_v44 = vpop.permute.xlu0 %2193 }
 0x728   : > { %v2203_v1 = vmul.f32 %v2194_v44, %v2160_v22  ;;  %2537 = vmatprep.mubr.bf16.mxu0 %v2208_v8 }
 0x72a   : > { %v2207_v33 = vpack.c.bf16 %v2203_v1, %v2203_v1 }
 0x72c   : > { %2538 = vmatmul.mubr.bf16.vlgmr.msra.gmra.mrb[44].mxu0 %v2207_v33 }
 0x795   : > { %v2937_v51 = vpop.f32.mrb[44].mxu1 }
 0x796   : > { %v2938_v38 = vpop.f32.mrb[45].mxu1 }
 0x797   : > { %v2939_v21 = vadd.f32 %v2938_v38, %v2937_v51  ;;  %v2940_v50 = vpop.f32.mrb[46].mxu1 }
 0x798   : > { %v2941_v19 = vpop.f32.mrb[47].mxu1 }
 0x7ff   : > { %v2959_v17 = vpop.f32.mrb[44].mxu0 }
 0x800   : > { %v2960_v24 = vpop.f32.mrb[45].mxu0 }
 0x801   : > { %v2961_v54 = vadd.f32 %v2960_v24, %v2959_v17  ;;  %v2962_v20 = vpop.f32.mrb[46].mxu0 }
 0x802   : > { %v2963_v23 = vpop.f32.mrb[47].mxu0 }
 0x803   : > { %v2540_v12 = vadd.f32 %v2961_v54, %v2939_v21 }
 0x805   : > { %2545 = vst [vmem:[%s529_s24] sm:$0xff] %v2540_v12 }
 0x806   : > { %3629 = shalt.err (!%p3626_p1)
}
 0x807   : > { %s3630_s5 = scalar_lea.hbm %s4830_s16, 128  ;;  %s3634_s27 = scalar_lea.hbm %s4973_s0, 256 }
 0x808   : > { %p3631_p10 = scmp.ne.s32.totalorder %s4830_s16, %s3630_s5  ;;  %p3635_p3 = scmp.lt.u32.totalorder %s4830_s16, %s4973_s0 }
 0x809   : > { %p3636_p12 = scmp.lt.u32.totalorder %s3634_s27, %s3630_s5  ;;  %p3638_p6 = scmp.lt.u32.totalorder %s3630_s5, %s4830_s16 }
 0x80a   : > { %p3632_p11 = pnand %p3631_p10, %p4974_p0 }
 0x80b   : > { %p3637_p13 = por %p3636_p12, %p3635_p3 }
 0x80c   : > { %p3633_p8 = pneg %p3632_p11 }
 0x80d   : > { %p3639_p7 = por %p3638_p6, %p3637_p13 }
 0x80f   : > { %p3640_p5 = pnand %p3639_p7, %p3633_p8 }
 0x811   : > { %3643 = shalt.err (!%p3640_p5)
}
 0x812   : > { %3069 = dma.vmem_to_hbm [thread:$0]  (%p4974_p0), %s4832_s12, 128, %s4830_s16, %s2547_s25  }
 0x813 PF: > { %s2573_s4 = sand.u32 1, %s3694_s30   ;;  %p4975_p2 = scmp.ne.s32.totalorder %s4932_s23, 0 }
 0x814   : > { %p4976_p4 = scmp.ge.s32.totalorder %s3714_s14, 2  ;;  %s2574_s24 = scalar_lea.sflag [#allocation8], %s2573_s4 }
 0x816   : > { %p3095_p9 = pnand %p4976_p4, %p4975_p2 }
 0x818   : > { %3689 = dma.done.wait (!%p3095_p9), %s2574_s24, 128  }
 0x819   : > { %3691 = vsyncadd (!%p3095_p9), %s2574_s24, 4294967168  ;;  %s30_s14 = sadd.s32 1, %s3714_s14   ;;  %s4977_s30 = smov %s3698_s10 }
 0x81a   : > { %p27_p1 = scmp.ge.s32.totalorder %s30_s14, 4   ;;  %s4978_s10 = smov %s3702_s11 }
 0x81b   : > { %s4979_s11 = smov %s3985_s18  ;;  %s4980_s12 = smov %s3710_s13 }
 0x81c   : > { %s4981_s13 = smov %s4983_s29  ;;  %29 = sbr.rel (!%p27_p1) target bundleno = 17 (0x11), region = 150 }
 0x823   :  { %2579 = vsyncpa [#allocation7], 1 }
 0x824   :  { %2581 = vsyncpa [#allocation7 + $0x1], 1 }
 0x825   :  { %2582 = vsyncpa [#allocation10], 1 }
 0x826   :  { %2584 = vsyncpa [#allocation10 + $0x1], 1 }
 0x827   :  { %2585 = vsyncpa [#allocation13], 1 }
 0x828   :  { %2586 = vsyncpa [#allocation16], 1 }
 0x829   :  { %2587 = vsyncpa [#allocation8], 1 }
 0x82a   :  { %2589 = vsyncpa [#allocation8 + $0x1], 1 }

</bundles_post_ra>
